<compile_context>
chip_gen: v6e
topology: v6e:2x2x1
jax: 0.10.0
libtpu: 0.0.40
codegen_flags: <defaults>
</compile_context>

<pallas_src>
import functools

import jax
import jax.numpy as jnp
from jax.experimental import pallas as pl
from jax.experimental.pallas import tpu as pltpu

_EPS = 1e-8
_VMEM_LIMIT_BYTES = 48 * 1024 * 1024   # safe on v7x (64 MiB/TC); headroom on v5e/v6e
_NUM_TENSORCORES = 2                   # v7x; harmless over-estimate on v5e/v6e


def _round_up(a, m):
    return (a + m - 1) // m * m


# ---------------------------------------------------------------------------
# color-space math (pure jnp, traced inside the kernel); pixel arrays are (NB, P)
# ---------------------------------------------------------------------------
def _rgb2hsv(r, g, b):
    cmax = jnp.maximum(jnp.maximum(r, g), b)
    cmin = jnp.minimum(jnp.minimum(r, g), b)
    delta = cmax - cmin
    inv_delta = pl.reciprocal(delta + _EPS, approx=True)
    hr = (g - b) * inv_delta
    hr = jnp.where(hr < 0.0, hr + 6.0, hr)          # == ((g-b)/(delta+eps)) % 6, |x| < 6
    hg = (b - r) * inv_delta + 2.0
    hb = (r - g) * inv_delta + 4.0
    # sequential overrides, same order as the torch reference
    hue = jnp.where(cmax == r, hr, 0.0)
    hue = jnp.where(cmax == g, hg, hue)
    hue = jnp.where(cmax == b, hb, hue)
    hue = jnp.where(cmax == 0.0, 0.0, hue)
    hue = hue * (1.0 / 6.0)
    sat = delta * pl.reciprocal(cmax + _EPS, approx=True)
    sat = jnp.where(cmax == 0.0, 0.0, sat)
    return hue, sat, cmax


def _hsv2rgb(h, s, v):
    # h, s, v already in [0, 1]; the torch clamp at entry is a no-op here.
    c = v * s
    m = v - c
    h6 = h * 6.0

    def chan(n):
        k = n + h6                                   # in [n, n+6]
        k = jnp.where(k >= 6.0, k - 6.0, k)          # == (n + h*6) mod 6
        t = jnp.clip(jnp.minimum(k, 4.0 - k), 0.0, 1.0)
        return v - c * t

    r = chan(5.0)
    g = chan(3.0)
    b = chan(1.0)
    # torch reference edge case: h == 1.0 (hue == 360) misses all segment masks -> gray.
    edge = h >= 1.0
    r = jnp.where(edge, m, r)
    g = jnp.where(edge, m, g)
    b = jnp.where(edge, m, b)
    return r, g, b


def _hsv_pipeline(r, g, b, bf, hf, sf):
    # rgb2hsv -> adjust_brightness -> adjust_hue -> adjust_saturate -> hsv2rgb
    # (hf is pre-multiplied by 255/360 in the wrapper)
    h, s, v = _rgb2hsv(r, g, b)
    v = jnp.clip(v * bf, 0.0, 1.0)                   # brightness
    t = h + hf                                       # hue shift
    h = t - jnp.floor(t)                             # == t % 1 (torch.remainder)
    s = jnp.clip(s * sf, 0.0, 1.0)                   # saturation
    return _hsv2rgb(h, s, v)


def _adjust_contrast(r, g, b, cf, inv_hw):
    # Per-image, per-channel mean over the true H*W pixels.  The lane-axis sum is done
    # as a matmul with a ones column (MXU, off the VALU/XLU).  Lane padding is zero,
    # so sum * 1/HW stays exact.  cf is (NB, 1) and broadcasts implicitly.
    ones = jnp.ones((r.shape[-1], 1), jnp.float32)
    mr = jnp.dot(r, ones, preferred_element_type=jnp.float32) * inv_hw
    mg = jnp.dot(g, ones, preferred_element_type=jnp.float32) * inv_hw
    mb = jnp.dot(b, ones, preferred_element_type=jnp.float32) * inv_hw
    r = jnp.clip((r - mr) * cf + mr, 0.0, 1.0)
    g = jnp.clip((g - mg) * cf + mg, 0.0, 1.0)
    b = jnp.clip((b - mb) * cf + mb, 0.0, 1.0)
    return r, g, b


# ---------------------------------------------------------------------------
# Pallas kernel: NB images per grid step, packed (NB, 3*P) lane-dense tiles
# ---------------------------------------------------------------------------
def _color_jitter_kernel(flag_ref, fac_ref, x_ref, o_ref, *, pw, inv_hw):
    fac = fac_ref[...]                      # (NB, 5): [brightness, hue', sat, contrast, apply]
    bf = fac[:, 0:1]
    hf = fac[:, 1:2]
    sf = fac[:, 2:3]
    cf = fac[:, 3:4]
    keep = fac[:, 4:5] > 0.5                # (NB, 1) per-image apply mask (broadcasts)

    def load(c):                            # static 128-aligned lane slice of the block
        return x_ref[:, c * pw:(c + 1) * pw].astype(jnp.float32)

    def finish(ro, go, bo):
        # Fallback is re-read from the input ref so the entry loads don't stay live
        # across the whole pipeline (cuts block-sized VMEM temporaries / spills).
        o_ref[:, 0 * pw:1 * pw] = jnp.where(keep, ro, load(0)).astype(o_ref.dtype)
        o_ref[:, 1 * pw:2 * pw] = jnp.where(keep, go, load(1)).astype(o_ref.dtype)
        o_ref[:, 2 * pw:3 * pw] = jnp.where(keep, bo, load(2)).astype(o_ref.dtype)

    order = flag_ref[0]

    @pl.when(order >= 0.5)                  # contrast first, then HSV pipeline
    def _():
        r, g, b = _adjust_contrast(load(0), load(1), load(2), cf, inv_hw)
        finish(*_hsv_pipeline(r, g, b, bf, hf, sf))

    @pl.when(order < 0.5)                   # HSV pipeline first, then contrast
    def _():
        r, g, b = _hsv_pipeline(load(0), load(1), load(2), bf, hf, sf)
        finish(*_adjust_contrast(r, g, b, cf, inv_hw))


# ---------------------------------------------------------------------------
# wrapper
# ---------------------------------------------------------------------------
def _choose_nb(n, p_chan):
    n8 = _round_up(max(n, 1), 8)
    # VMEM: keep each per-channel (NB, P) f32 block at ~<= 1 MiB, so the I/O blocks
    # (double-buffered) plus ~10 live block temporaries stay well under the limit.
    nb_vmem = max(8, ((1 << 20) // (4 * p_chan)) // 8 * 8)
    # Grid: aim for >= 4 steps per TensorCore (megacore sharding + DMA/compute overlap)
    # whenever the batch is large enough.
    nb_grid = max(8, (n8 // (4 * _NUM_TENSORCORES)) // 8 * 8)
    return min(n8, nb_vmem, nb_grid)


def color_jitter_pallas(x, factors, order_flag, *, io_dtype=None):
    """x: (N, 3, H, W); factors: (N, 5) f32 [brightness, hue*255/360, sat, contrast, apply];
    order_flag: (1,) f32 (>= 0.5 -> contrast before the HSV pipeline)."""
    N, C, H, W = x.shape
    assert C == 3
    orig_dtype = x.dtype
    HW = H * W
    P = _round_up(HW, 128)                  # lane-dense per-channel pixel width

    NB = _choose_nb(N, P)
    Npad = _round_up(N, NB)

    if io_dtype is not None and io_dtype != x.dtype:
        # TODO(synk): to really save HBM on v5e, feed bf16 straight from the producer
        # instead of casting here (the cast itself is an extra HBM pass).
        x = x.astype(io_dtype)
    itemsize = jnp.dtype(x.dtype).itemsize

    # VMEM feasibility: in + out blocks, double-buffered, plus ~10 f32 block temps.
    est_vmem = 2 * (2 * NB * 3 * P * itemsize) + 10 * NB * P * 4
    if est_vmem > _VMEM_LIMIT_BYTES:
        # TODO(synk): pixel-dim tiling + two-pass contrast mean for very large images.
        raise NotImplementedError(
            f"image too large for whole-pixel blocks (est. {est_vmem >> 20} MiB VMEM)")

    if P == HW:
        x2 = x.reshape(N, 3 * HW)                    # free, contiguous reshape
        if Npad != N:
            x2 = jnp.pad(x2, ((0, Npad - N), (0, 0)))
    else:
        # One pad pass: zero-pad each channel's pixels to P (zeros map to zeros through
        # the pipeline, so in-kernel contrast sums * 1/HW stay exact), then flatten.
        x2 = jnp.pad(x.reshape(N, 3, HW),
                     ((0, Npad - N), (0, 0), (0, P - HW))).reshape(Npad, 3 * P)

    fac = factors.astype(jnp.float32)
    if Npad != N:
        fac = jnp.pad(fac, ((0, Npad - N), (0, 0)))  # padded rows: apply=0 -> passthrough

    img_spec = pl.BlockSpec((NB, 3 * P), lambda n: (n, 0))
    fac_spec = pl.BlockSpec((NB, 5), lambda n: (n, 0))

    kernel = functools.partial(_color_jitter_kernel, pw=P, inv_hw=1.0 / HW)
    out = pl.pallas_call(
        kernel,
        out_shape=jax.ShapeDtypeStruct((Npad, 3 * P), x2.dtype),
        grid=(Npad // NB,),
        in_specs=[
            pl.BlockSpec(memory_space=pltpu.MemorySpace.SMEM),   # order flag
            fac_spec,                                            # per-image factors
            img_spec,                                            # packed rgb pixels
        ],
        out_specs=img_spec,
        compiler_params=pltpu.CompilerParams(
            dimension_semantics=("parallel",),
            vmem_limit_bytes=_VMEM_LIMIT_BYTES,
        ),
    )(order_flag, fac, x2)

    if P == HW:
        out = out[:N].reshape(N, 3, H, W) if Npad != N else out.reshape(N, 3, H, W)
    else:
        out = out.reshape(Npad, 3, P)[:N, :, :HW].reshape(N, 3, H, W)
    return out.astype(orig_dtype)


# ---------------------------------------------------------------------------
# glue: parameter ranges + deterministic random factor sampling (plain JAX)
# ---------------------------------------------------------------------------
def _check_input(value, center=1.0, clip_first_on_zero=True):
    lo, hi = center - value, center + value
    if clip_first_on_zero:
        lo = max(lo, 0.0)
    return lo, hi


def color_jitter_forward(x, key, *, brightness, contrast, saturation, hue,
                         p, batch_size, stack_size, io_dtype=None):
    """Mirrors ColorJitterLayer.forward: per-image factors (repeated per stack), a
    per-image apply mask, a single order coin-flip, then the fused Pallas kernel."""
    n = batch_size * stack_size
    assert x.shape[0] == n and x.shape[1] == 3

    b_lo, b_hi = _check_input(brightness)
    c_lo, c_hi = _check_input(contrast)
    s_lo, s_hi = _check_input(saturation)
    h_lo, h_hi = -hue, hue

    kb, kh, ks, kc, km, ko = jax.random.split(key, 6)

    def _sample(k, lo, hi):
        f = jax.random.uniform(k, (batch_size,), jnp.float32, lo, hi)
        return jnp.repeat(f, stack_size)     # reshape(-1,1).repeat(1,S).reshape(-1)

    bf = _sample(kb, b_lo, b_hi)
    hf = _sample(kh, h_lo, h_hi) * (255.0 / 360.0)   # hue pre-scale hoisted out of kernel
    sf = _sample(ks, s_lo, s_hi)
    cf = _sample(kc, c_lo, c_hi)
    mask = jax.random.bernoulli(km, p, (n,)).astype(jnp.float32)
    factors = jnp.stack([bf, hf, sf, cf, mask], axis=1)          # (N, 5)
    order_flag = jax.random.uniform(ko, (1,), jnp.float32)       # >= 0.5: contrast first

    return color_jitter_pallas(x, factors, order_flag, io_dtype=io_dtype)


if __name__ == "__main__":
    key = jax.random.PRNGKey(0)
    k_img, k_fac = jax.random.split(key)

    batch_size, stack_size = 2, 3            # N = 6 images
    H = W = 16
    x = jax.random.uniform(k_img, (batch_size * stack_size, 3, H, W), jnp.float32)

    out = color_jitter_forward(
        x, k_fac,
        brightness=0.4, contrast=0.4, saturation=0.4, hue=0.5,
        p=0.8, batch_size=batch_size, stack_size=stack_size)
    jax.block_until_ready(out)

    assert out.shape == x.shape and out.dtype == x.dtype
    assert bool(jnp.all(jnp.isfinite(out)))
    print("KERNEL_OK")
</pallas_src>

<mosaic_0001>
module attributes {stable_mosaic.version = 11 : i64} {
  func.func @_color_jitter_kernel(%arg0: i32, %arg1: memref<1xf32, #tpu.memory_space<smem>>, %arg2: memref<8x5xf32, #tpu.memory_space<vmem>>, %arg3: memref<8x768xf32, #tpu.memory_space<vmem>>, %arg4: memref<8x768xf32, #tpu.memory_space<vmem>>) attributes {dimension_semantics = [#tpu.dimension_semantics<parallel>], iteration_bounds = array<i64: 1>, scalar_prefetch = 0 : i64, scratch_operands = 0 : i64, tpu.core_type = #tpu.core_type<tc>, window_params = [{transform_indices = @transform_0, window_bounds = array<i64: 1>}, {transform_indices = @transform_1, window_bounds = array<i64: 8, 5>}, {transform_indices = @transform_2, window_bounds = array<i64: 8, 768>}, {transform_indices = @transform_3, window_bounds = array<i64: 8, 768>}]} {
    %c0 = arith.constant 0 : index
    %c0_0 = arith.constant 0 : index
    %0 = vector.load %arg2[%c0, %c0_0] : memref<8x5xf32, #tpu.memory_space<vmem>>, vector<8x5xf32>
    %1 = vector.extract_strided_slice %0 {offsets = [0, 0], sizes = [8, 1], strides = [1, 1]} : vector<8x5xf32> to vector<8x1xf32>
    %2 = vector.extract_strided_slice %0 {offsets = [0, 1], sizes = [8, 1], strides = [1, 1]} : vector<8x5xf32> to vector<8x1xf32>
    %3 = vector.extract_strided_slice %0 {offsets = [0, 2], sizes = [8, 1], strides = [1, 1]} : vector<8x5xf32> to vector<8x1xf32>
    %4 = vector.extract_strided_slice %0 {offsets = [0, 3], sizes = [8, 1], strides = [1, 1]} : vector<8x5xf32> to vector<8x1xf32>
    %5 = vector.extract_strided_slice %0 {offsets = [0, 4], sizes = [8, 1], strides = [1, 1]} : vector<8x5xf32> to vector<8x1xf32>
    %cst = arith.constant 5.000000e-01 : f32
    %6 = vector.broadcast %cst : f32 to vector<8x1xf32>
    %7 = arith.cmpf ogt, %5, %6 : vector<8x1xf32>
    %c0_1 = arith.constant 0 : index
    %8 = memref.load %arg1[%c0_1] : memref<1xf32, #tpu.memory_space<smem>>
    %cst_2 = arith.constant 5.000000e-01 : f32
    %9 = arith.cmpf oge, %8, %cst_2 : f32
    %10 = arith.extui %9 : i1 to i32
    %c0_i32 = arith.constant 0 : i32
    %11 = arith.cmpi ne, %10, %c0_i32 : i32
    scf.if %11 {
      %c0_5 = arith.constant 0 : index
      %c0_6 = arith.constant 0 : index
      %15 = vector.load %arg3[%c0_5, %c0_6] : memref<8x768xf32, #tpu.memory_space<vmem>>, vector<8x256xf32>
      %c0_7 = arith.constant 0 : index
      %c256 = arith.constant 256 : index
      %16 = vector.load %arg3[%c0_7, %c256] : memref<8x768xf32, #tpu.memory_space<vmem>>, vector<8x256xf32>
      %c0_8 = arith.constant 0 : index
      %c512 = arith.constant 512 : index
      %17 = vector.load %arg3[%c0_8, %c512] : memref<8x768xf32, #tpu.memory_space<vmem>>, vector<8x256xf32>
      %cst_9 = arith.constant 1.000000e+00 : f32
      %18 = vector.broadcast %cst_9 : f32 to vector<256x1xf32>
      %cst_10 = arith.constant dense<0.000000e+00> : vector<8x1xf32>
      %19 = tpu.matmul %15, %18, %cst_10 {dimension_numbers = #tpu.dot_dimension_numbers<[1], [0], [0], [1], [0, 0, 1, 1], [], []>} : vector<8x256xf32>, vector<256x1xf32>, vector<8x1xf32> -> vector<8x1xf32>
      %cst_11 = arith.constant 3.906250e-03 : f32
      %20 = vector.broadcast %cst_11 : f32 to vector<8x1xf32>
      %21 = arith.mulf %19, %20 : vector<8x1xf32>
      %cst_12 = arith.constant dense<0.000000e+00> : vector<8x1xf32>
      %22 = tpu.matmul %16, %18, %cst_12 {dimension_numbers = #tpu.dot_dimension_numbers<[1], [0], [0], [1], [0, 0, 1, 1], [], []>} : vector<8x256xf32>, vector<256x1xf32>, vector<8x1xf32> -> vector<8x1xf32>
      %cst_13 = arith.constant 3.906250e-03 : f32
      %23 = vector.broadcast %cst_13 : f32 to vector<8x1xf32>
      %24 = arith.mulf %22, %23 : vector<8x1xf32>
      %cst_14 = arith.constant dense<0.000000e+00> : vector<8x1xf32>
      %25 = tpu.matmul %17, %18, %cst_14 {dimension_numbers = #tpu.dot_dimension_numbers<[1], [0], [0], [1], [0, 0, 1, 1], [], []>} : vector<8x256xf32>, vector<256x1xf32>, vector<8x1xf32> -> vector<8x1xf32>
      %cst_15 = arith.constant 3.906250e-03 : f32
      %26 = vector.broadcast %cst_15 : f32 to vector<8x1xf32>
      %27 = arith.mulf %25, %26 : vector<8x1xf32>
      %28 = vector.broadcast %21 : vector<8x1xf32> to vector<8x256xf32>
      %29 = arith.subf %15, %28 : vector<8x256xf32>
      %30 = vector.broadcast %4 : vector<8x1xf32> to vector<8x256xf32>
      %31 = arith.mulf %29, %30 : vector<8x256xf32>
      %32 = vector.broadcast %21 : vector<8x1xf32> to vector<8x256xf32>
      %33 = arith.addf %31, %32 : vector<8x256xf32>
      %cst_16 = arith.constant 0.000000e+00 : f32
      %cst_17 = arith.constant 1.000000e+00 : f32
      %34 = vector.broadcast %cst_16 : f32 to vector<8x256xf32>
      %35 = arith.maximumf %34, %33 : vector<8x256xf32>
      %36 = vector.broadcast %cst_17 : f32 to vector<8x256xf32>
      %37 = arith.minimumf %36, %35 : vector<8x256xf32>
      %38 = vector.broadcast %24 : vector<8x1xf32> to vector<8x256xf32>
      %39 = arith.subf %16, %38 : vector<8x256xf32>
      %40 = vector.broadcast %4 : vector<8x1xf32> to vector<8x256xf32>
      %41 = arith.mulf %39, %40 : vector<8x256xf32>
      %42 = vector.broadcast %24 : vector<8x1xf32> to vector<8x256xf32>
      %43 = arith.addf %41, %42 : vector<8x256xf32>
      %cst_18 = arith.constant 0.000000e+00 : f32
      %cst_19 = arith.constant 1.000000e+00 : f32
      %44 = vector.broadcast %cst_18 : f32 to vector<8x256xf32>
      %45 = arith.maximumf %44, %43 : vector<8x256xf32>
      %46 = vector.broadcast %cst_19 : f32 to vector<8x256xf32>
      %47 = arith.minimumf %46, %45 : vector<8x256xf32>
      %48 = vector.broadcast %27 : vector<8x1xf32> to vector<8x256xf32>
      %49 = arith.subf %17, %48 : vector<8x256xf32>
      %50 = vector.broadcast %4 : vector<8x1xf32> to vector<8x256xf32>
      %51 = arith.mulf %49, %50 : vector<8x256xf32>
      %52 = vector.broadcast %27 : vector<8x1xf32> to vector<8x256xf32>
      %53 = arith.addf %51, %52 : vector<8x256xf32>
      %cst_20 = arith.constant 0.000000e+00 : f32
      %cst_21 = arith.constant 1.000000e+00 : f32
      %54 = vector.broadcast %cst_20 : f32 to vector<8x256xf32>
      %55 = arith.maximumf %54, %53 : vector<8x256xf32>
      %56 = vector.broadcast %cst_21 : f32 to vector<8x256xf32>
      %57 = arith.minimumf %56, %55 : vector<8x256xf32>
      %58 = arith.maximumf %37, %47 : vector<8x256xf32>
      %59 = arith.maximumf %58, %57 : vector<8x256xf32>
      %60 = arith.minimumf %37, %47 : vector<8x256xf32>
      %61 = arith.minimumf %60, %57 : vector<8x256xf32>
      %62 = arith.subf %59, %61 : vector<8x256xf32>
      %cst_22 = arith.constant 9.99999993E-9 : f32
      %63 = vector.broadcast %cst_22 : f32 to vector<8x256xf32>
      %64 = arith.addf %62, %63 : vector<8x256xf32>
      %65 = tpu.reciprocal %64 {approx = true} : vector<8x256xf32> -> vector<8x256xf32>
      %66 = arith.subf %47, %57 : vector<8x256xf32>
      %67 = arith.mulf %66, %65 : vector<8x256xf32>
      %cst_23 = arith.constant 0.000000e+00 : f32
      %68 = vector.broadcast %cst_23 : f32 to vector<8x256xf32>
      %69 = arith.cmpf olt, %67, %68 : vector<8x256xf32>
      %cst_24 = arith.constant 6.000000e+00 : f32
      %70 = vector.broadcast %cst_24 : f32 to vector<8x256xf32>
      %71 = arith.addf %67, %70 : vector<8x256xf32>
      %72 = arith.select %69, %71, %67 : vector<8x256xi1>, vector<8x256xf32>
      %73 = arith.subf %57, %37 : vector<8x256xf32>
      %74 = arith.mulf %73, %65 : vector<8x256xf32>
      %cst_25 = arith.constant 2.000000e+00 : f32
      %75 = vector.broadcast %cst_25 : f32 to vector<8x256xf32>
      %76 = arith.addf %74, %75 : vector<8x256xf32>
      %77 = arith.subf %37, %47 : vector<8x256xf32>
      %78 = arith.mulf %77, %65 : vector<8x256xf32>
      %cst_26 = arith.constant 4.000000e+00 : f32
      %79 = vector.broadcast %cst_26 : f32 to vector<8x256xf32>
      %80 = arith.addf %78, %79 : vector<8x256xf32>
      %81 = arith.cmpf oeq, %59, %37 : vector<8x256xf32>
      %cst_27 = arith.constant 0.000000e+00 : f32
      %82 = vector.broadcast %cst_27 : f32 to vector<8x256xf32>
      %83 = arith.select %81, %72, %82 : vector<8x256xi1>, vector<8x256xf32>
      %84 = arith.cmpf oeq, %59, %47 : vector<8x256xf32>
      %85 = arith.select %84, %76, %83 : vector<8x256xi1>, vector<8x256xf32>
      %86 = arith.cmpf oeq, %59, %57 : vector<8x256xf32>
      %87 = arith.select %86, %80, %85 : vector<8x256xi1>, vector<8x256xf32>
      %cst_28 = arith.constant 0.000000e+00 : f32
      %88 = vector.broadcast %cst_28 : f32 to vector<8x256xf32>
      %89 = arith.cmpf oeq, %59, %88 : vector<8x256xf32>
      %cst_29 = arith.constant 0.000000e+00 : f32
      %90 = vector.broadcast %cst_29 : f32 to vector<8x256xf32>
      %91 = arith.select %89, %90, %87 : vector<8x256xi1>, vector<8x256xf32>
      %cst_30 = arith.constant 0.166666672 : f32
      %92 = vector.broadcast %cst_30 : f32 to vector<8x256xf32>
      %93 = arith.mulf %91, %92 : vector<8x256xf32>
      %cst_31 = arith.constant 9.99999993E-9 : f32
      %94 = vector.broadcast %cst_31 : f32 to vector<8x256xf32>
      %95 = arith.addf %59, %94 : vector<8x256xf32>
      %96 = tpu.reciprocal %95 {approx = true} : vector<8x256xf32> -> vector<8x256xf32>
      %97 = arith.mulf %62, %96 : vector<8x256xf32>
      %cst_32 = arith.constant 0.000000e+00 : f32
      %98 = vector.broadcast %cst_32 : f32 to vector<8x256xf32>
      %99 = arith.cmpf oeq, %59, %98 : vector<8x256xf32>
      %cst_33 = arith.constant 0.000000e+00 : f32
      %100 = vector.broadcast %cst_33 : f32 to vector<8x256xf32>
      %101 = arith.select %99, %100, %97 : vector<8x256xi1>, vector<8x256xf32>
      %102 = vector.broadcast %1 : vector<8x1xf32> to vector<8x256xf32>
      %103 = arith.mulf %59, %102 : vector<8x256xf32>
      %cst_34 = arith.constant 0.000000e+00 : f32
      %cst_35 = arith.constant 1.000000e+00 : f32
      %104 = vector.broadcast %cst_34 : f32 to vector<8x256xf32>
      %105 = arith.maximumf %104, %103 : vector<8x256xf32>
      %106 = vector.broadcast %cst_35 : f32 to vector<8x256xf32>
      %107 = arith.minimumf %106, %105 : vector<8x256xf32>
      %108 = vector.broadcast %2 : vector<8x1xf32> to vector<8x256xf32>
      %109 = arith.addf %93, %108 : vector<8x256xf32>
      %110 = math.floor %109 : vector<8x256xf32>
      %111 = arith.subf %109, %110 : vector<8x256xf32>
      %112 = vector.broadcast %3 : vector<8x1xf32> to vector<8x256xf32>
      %113 = arith.mulf %101, %112 : vector<8x256xf32>
      %cst_36 = arith.constant 0.000000e+00 : f32
      %cst_37 = arith.constant 1.000000e+00 : f32
      %114 = vector.broadcast %cst_36 : f32 to vector<8x256xf32>
      %115 = arith.maximumf %114, %113 : vector<8x256xf32>
      %116 = vector.broadcast %cst_37 : f32 to vector<8x256xf32>
      %117 = arith.minimumf %116, %115 : vector<8x256xf32>
      %118 = arith.mulf %107, %117 : vector<8x256xf32>
      %119 = arith.subf %107, %118 : vector<8x256xf32>
      %cst_38 = arith.constant 6.000000e+00 : f32
      %120 = vector.broadcast %cst_38 : f32 to vector<8x256xf32>
      %121 = arith.mulf %111, %120 : vector<8x256xf32>
      %cst_39 = arith.constant 5.000000e+00 : f32
      %122 = vector.broadcast %cst_39 : f32 to vector<8x256xf32>
      %123 = arith.addf %122, %121 : vector<8x256xf32>
      %cst_40 = arith.constant 6.000000e+00 : f32
      %124 = vector.broadcast %cst_40 : f32 to vector<8x256xf32>
      %125 = arith.cmpf oge, %123, %124 : vector<8x256xf32>
      %cst_41 = arith.constant 6.000000e+00 : f32
      %126 = vector.broadcast %cst_41 : f32 to vector<8x256xf32>
      %127 = arith.subf %123, %126 : vector<8x256xf32>
      %128 = arith.select %125, %127, %123 : vector<8x256xi1>, vector<8x256xf32>
      %cst_42 = arith.constant 4.000000e+00 : f32
      %129 = vector.broadcast %cst_42 : f32 to vector<8x256xf32>
      %130 = arith.subf %129, %128 : vector<8x256xf32>
      %131 = arith.minimumf %128, %130 : vector<8x256xf32>
      %cst_43 = arith.constant 0.000000e+00 : f32
      %cst_44 = arith.constant 1.000000e+00 : f32
      %132 = vector.broadcast %cst_43 : f32 to vector<8x256xf32>
      %133 = arith.maximumf %132, %131 : vector<8x256xf32>
      %134 = vector.broadcast %cst_44 : f32 to vector<8x256xf32>
      %135 = arith.minimumf %134, %133 : vector<8x256xf32>
      %136 = arith.mulf %118, %135 : vector<8x256xf32>
      %137 = arith.subf %107, %136 : vector<8x256xf32>
      %cst_45 = arith.constant 3.000000e+00 : f32
      %138 = vector.broadcast %cst_45 : f32 to vector<8x256xf32>
      %139 = arith.addf %138, %121 : vector<8x256xf32>
      %cst_46 = arith.constant 6.000000e+00 : f32
      %140 = vector.broadcast %cst_46 : f32 to vector<8x256xf32>
      %141 = arith.cmpf oge, %139, %140 : vector<8x256xf32>
      %cst_47 = arith.constant 6.000000e+00 : f32
      %142 = vector.broadcast %cst_47 : f32 to vector<8x256xf32>
      %143 = arith.subf %139, %142 : vector<8x256xf32>
      %144 = arith.select %141, %143, %139 : vector<8x256xi1>, vector<8x256xf32>
      %cst_48 = arith.constant 4.000000e+00 : f32
      %145 = vector.broadcast %cst_48 : f32 to vector<8x256xf32>
      %146 = arith.subf %145, %144 : vector<8x256xf32>
      %147 = arith.minimumf %144, %146 : vector<8x256xf32>
      %cst_49 = arith.constant 0.000000e+00 : f32
      %cst_50 = arith.constant 1.000000e+00 : f32
      %148 = vector.broadcast %cst_49 : f32 to vector<8x256xf32>
      %149 = arith.maximumf %148, %147 : vector<8x256xf32>
      %150 = vector.broadcast %cst_50 : f32 to vector<8x256xf32>
      %151 = arith.minimumf %150, %149 : vector<8x256xf32>
      %152 = arith.mulf %118, %151 : vector<8x256xf32>
      %153 = arith.subf %107, %152 : vector<8x256xf32>
      %cst_51 = arith.constant 1.000000e+00 : f32
      %154 = vector.broadcast %cst_51 : f32 to vector<8x256xf32>
      %155 = arith.addf %154, %121 : vector<8x256xf32>
      %cst_52 = arith.constant 6.000000e+00 : f32
      %156 = vector.broadcast %cst_52 : f32 to vector<8x256xf32>
      %157 = arith.cmpf oge, %155, %156 : vector<8x256xf32>
      %cst_53 = arith.constant 6.000000e+00 : f32
      %158 = vector.broadcast %cst_53 : f32 to vector<8x256xf32>
      %159 = arith.subf %155, %158 : vector<8x256xf32>
      %160 = arith.select %157, %159, %155 : vector<8x256xi1>, vector<8x256xf32>
      %cst_54 = arith.constant 4.000000e+00 : f32
      %161 = vector.broadcast %cst_54 : f32 to vector<8x256xf32>
      %162 = arith.subf %161, %160 : vector<8x256xf32>
      %163 = arith.minimumf %160, %162 : vector<8x256xf32>
      %cst_55 = arith.constant 0.000000e+00 : f32
      %cst_56 = arith.constant 1.000000e+00 : f32
      %164 = vector.broadcast %cst_55 : f32 to vector<8x256xf32>
      %165 = arith.maximumf %164, %163 : vector<8x256xf32>
      %166 = vector.broadcast %cst_56 : f32 to vector<8x256xf32>
      %167 = arith.minimumf %166, %165 : vector<8x256xf32>
      %168 = arith.mulf %118, %167 : vector<8x256xf32>
      %169 = arith.subf %107, %168 : vector<8x256xf32>
      %cst_57 = arith.constant 1.000000e+00 : f32
      %170 = vector.broadcast %cst_57 : f32 to vector<8x256xf32>
      %171 = arith.cmpf oge, %111, %170 : vector<8x256xf32>
      %172 = arith.select %171, %119, %137 : vector<8x256xi1>, vector<8x256xf32>
      %173 = arith.select %171, %119, %153 : vector<8x256xi1>, vector<8x256xf32>
      %174 = arith.select %171, %119, %169 : vector<8x256xi1>, vector<8x256xf32>
      %c0_58 = arith.constant 0 : index
      %c0_59 = arith.constant 0 : index
      %175 = vector.load %arg3[%c0_58, %c0_59] : memref<8x768xf32, #tpu.memory_space<vmem>>, vector<8x256xf32>
      %176 = vector.shape_cast %7 : vector<8x1xi1> to vector<8x1xi1>
      %177 = vector.broadcast %176 : vector<8x1xi1> to vector<8x256xi1>
      %178 = arith.select %177, %172, %175 : vector<8x256xi1>, vector<8x256xf32>
      %c0_60 = arith.constant 0 : index
      %c0_61 = arith.constant 0 : index
      %179 = vector.load %arg4[%c0_60, %c0_61] : memref<8x768xf32, #tpu.memory_space<vmem>>, vector<8x256xf32>
      tpu.vector_store %arg4[%c0_60, %c0_61], %178 {strides = array<i32>} : memref<8x768xf32, #tpu.memory_space<vmem>>, vector<8x256xf32>,
      %c0_62 = arith.constant 0 : index
      %c256_63 = arith.constant 256 : index
      %180 = vector.load %arg3[%c0_62, %c256_63] : memref<8x768xf32, #tpu.memory_space<vmem>>, vector<8x256xf32>
      %181 = vector.shape_cast %7 : vector<8x1xi1> to vector<8x1xi1>
      %182 = vector.broadcast %181 : vector<8x1xi1> to vector<8x256xi1>
      %183 = arith.select %182, %173, %180 : vector<8x256xi1>, vector<8x256xf32>
      %c0_64 = arith.constant 0 : index
      %c256_65 = arith.constant 256 : index
      %184 = vector.load %arg4[%c0_64, %c256_65] : memref<8x768xf32, #tpu.memory_space<vmem>>, vector<8x256xf32>
      tpu.vector_store %arg4[%c0_64, %c256_65], %183 {strides = array<i32>} : memref<8x768xf32, #tpu.memory_space<vmem>>, vector<8x256xf32>,
      %c0_66 = arith.constant 0 : index
      %c512_67 = arith.constant 512 : index
      %185 = vector.load %arg3[%c0_66, %c512_67] : memref<8x768xf32, #tpu.memory_space<vmem>>, vector<8x256xf32>
      %186 = vector.shape_cast %7 : vector<8x1xi1> to vector<8x1xi1>
      %187 = vector.broadcast %186 : vector<8x1xi1> to vector<8x256xi1>
      %188 = arith.select %187, %174, %185 : vector<8x256xi1>, vector<8x256xf32>
      %c0_68 = arith.constant 0 : index
      %c512_69 = arith.constant 512 : index
      %189 = vector.load %arg4[%c0_68, %c512_69] : memref<8x768xf32, #tpu.memory_space<vmem>>, vector<8x256xf32>
      tpu.vector_store %arg4[%c0_68, %c512_69], %188 {strides = array<i32>} : memref<8x768xf32, #tpu.memory_space<vmem>>, vector<8x256xf32>,
    } else {
    }
    %cst_3 = arith.constant 5.000000e-01 : f32
    %12 = arith.cmpf olt, %8, %cst_3 : f32
    %13 = arith.extui %12 : i1 to i32
    %c0_i32_4 = arith.constant 0 : i32
    %14 = arith.cmpi ne, %13, %c0_i32_4 : i32
    scf.if %14 {
      %c0_5 = arith.constant 0 : index
      %c0_6 = arith.constant 0 : index
      %15 = vector.load %arg3[%c0_5, %c0_6] : memref<8x768xf32, #tpu.memory_space<vmem>>, vector<8x256xf32>
      %c0_7 = arith.constant 0 : index
      %c256 = arith.constant 256 : index
      %16 = vector.load %arg3[%c0_7, %c256] : memref<8x768xf32, #tpu.memory_space<vmem>>, vector<8x256xf32>
      %c0_8 = arith.constant 0 : index
      %c512 = arith.constant 512 : index
      %17 = vector.load %arg3[%c0_8, %c512] : memref<8x768xf32, #tpu.memory_space<vmem>>, vector<8x256xf32>
      %18 = arith.maximumf %15, %16 : vector<8x256xf32>
      %19 = arith.maximumf %18, %17 : vector<8x256xf32>
      %20 = arith.minimumf %15, %16 : vector<8x256xf32>
      %21 = arith.minimumf %20, %17 : vector<8x256xf32>
      %22 = arith.subf %19, %21 : vector<8x256xf32>
      %cst_9 = arith.constant 9.99999993E-9 : f32
      %23 = vector.broadcast %cst_9 : f32 to vector<8x256xf32>
      %24 = arith.addf %22, %23 : vector<8x256xf32>
      %25 = tpu.reciprocal %24 {approx = true} : vector<8x256xf32> -> vector<8x256xf32>
      %26 = arith.subf %16, %17 : vector<8x256xf32>
      %27 = arith.mulf %26, %25 : vector<8x256xf32>
      %cst_10 = arith.constant 0.000000e+00 : f32
      %28 = vector.broadcast %cst_10 : f32 to vector<8x256xf32>
      %29 = arith.cmpf olt, %27, %28 : vector<8x256xf32>
      %cst_11 = arith.constant 6.000000e+00 : f32
      %30 = vector.broadcast %cst_11 : f32 to vector<8x256xf32>
      %31 = arith.addf %27, %30 : vector<8x256xf32>
      %32 = arith.select %29, %31, %27 : vector<8x256xi1>, vector<8x256xf32>
      %33 = arith.subf %17, %15 : vector<8x256xf32>
      %34 = arith.mulf %33, %25 : vector<8x256xf32>
      %cst_12 = arith.constant 2.000000e+00 : f32
      %35 = vector.broadcast %cst_12 : f32 to vector<8x256xf32>
      %36 = arith.addf %34, %35 : vector<8x256xf32>
      %37 = arith.subf %15, %16 : vector<8x256xf32>
      %38 = arith.mulf %37, %25 : vector<8x256xf32>
      %cst_13 = arith.constant 4.000000e+00 : f32
      %39 = vector.broadcast %cst_13 : f32 to vector<8x256xf32>
      %40 = arith.addf %38, %39 : vector<8x256xf32>
      %41 = arith.cmpf oeq, %19, %15 : vector<8x256xf32>
      %cst_14 = arith.constant 0.000000e+00 : f32
      %42 = vector.broadcast %cst_14 : f32 to vector<8x256xf32>
      %43 = arith.select %41, %32, %42 : vector<8x256xi1>, vector<8x256xf32>
      %44 = arith.cmpf oeq, %19, %16 : vector<8x256xf32>
      %45 = arith.select %44, %36, %43 : vector<8x256xi1>, vector<8x256xf32>
      %46 = arith.cmpf oeq, %19, %17 : vector<8x256xf32>
      %47 = arith.select %46, %40, %45 : vector<8x256xi1>, vector<8x256xf32>
      %cst_15 = arith.constant 0.000000e+00 : f32
      %48 = vector.broadcast %cst_15 : f32 to vector<8x256xf32>
      %49 = arith.cmpf oeq, %19, %48 : vector<8x256xf32>
      %cst_16 = arith.constant 0.000000e+00 : f32
      %50 = vector.broadcast %cst_16 : f32 to vector<8x256xf32>
      %51 = arith.select %49, %50, %47 : vector<8x256xi1>, vector<8x256xf32>
      %cst_17 = arith.constant 0.166666672 : f32
      %52 = vector.broadcast %cst_17 : f32 to vector<8x256xf32>
      %53 = arith.mulf %51, %52 : vector<8x256xf32>
      %cst_18 = arith.constant 9.99999993E-9 : f32
      %54 = vector.broadcast %cst_18 : f32 to vector<8x256xf32>
      %55 = arith.addf %19, %54 : vector<8x256xf32>
      %56 = tpu.reciprocal %55 {approx = true} : vector<8x256xf32> -> vector<8x256xf32>
      %57 = arith.mulf %22, %56 : vector<8x256xf32>
      %cst_19 = arith.constant 0.000000e+00 : f32
      %58 = vector.broadcast %cst_19 : f32 to vector<8x256xf32>
      %59 = arith.cmpf oeq, %19, %58 : vector<8x256xf32>
      %cst_20 = arith.constant 0.000000e+00 : f32
      %60 = vector.broadcast %cst_20 : f32 to vector<8x256xf32>
      %61 = arith.select %59, %60, %57 : vector<8x256xi1>, vector<8x256xf32>
      %62 = vector.broadcast %1 : vector<8x1xf32> to vector<8x256xf32>
      %63 = arith.mulf %19, %62 : vector<8x256xf32>
      %cst_21 = arith.constant 0.000000e+00 : f32
      %cst_22 = arith.constant 1.000000e+00 : f32
      %64 = vector.broadcast %cst_21 : f32 to vector<8x256xf32>
      %65 = arith.maximumf %64, %63 : vector<8x256xf32>
      %66 = vector.broadcast %cst_22 : f32 to vector<8x256xf32>
      %67 = arith.minimumf %66, %65 : vector<8x256xf32>
      %68 = vector.broadcast %2 : vector<8x1xf32> to vector<8x256xf32>
      %69 = arith.addf %53, %68 : vector<8x256xf32>
      %70 = math.floor %69 : vector<8x256xf32>
      %71 = arith.subf %69, %70 : vector<8x256xf32>
      %72 = vector.broadcast %3 : vector<8x1xf32> to vector<8x256xf32>
      %73 = arith.mulf %61, %72 : vector<8x256xf32>
      %cst_23 = arith.constant 0.000000e+00 : f32
      %cst_24 = arith.constant 1.000000e+00 : f32
      %74 = vector.broadcast %cst_23 : f32 to vector<8x256xf32>
      %75 = arith.maximumf %74, %73 : vector<8x256xf32>
      %76 = vector.broadcast %cst_24 : f32 to vector<8x256xf32>
      %77 = arith.minimumf %76, %75 : vector<8x256xf32>
      %78 = arith.mulf %67, %77 : vector<8x256xf32>
      %79 = arith.subf %67, %78 : vector<8x256xf32>
      %cst_25 = arith.constant 6.000000e+00 : f32
      %80 = vector.broadcast %cst_25 : f32 to vector<8x256xf32>
      %81 = arith.mulf %71, %80 : vector<8x256xf32>
      %cst_26 = arith.constant 5.000000e+00 : f32
      %82 = vector.broadcast %cst_26 : f32 to vector<8x256xf32>
      %83 = arith.addf %82, %81 : vector<8x256xf32>
      %cst_27 = arith.constant 6.000000e+00 : f32
      %84 = vector.broadcast %cst_27 : f32 to vector<8x256xf32>
      %85 = arith.cmpf oge, %83, %84 : vector<8x256xf32>
      %cst_28 = arith.constant 6.000000e+00 : f32
      %86 = vector.broadcast %cst_28 : f32 to vector<8x256xf32>
      %87 = arith.subf %83, %86 : vector<8x256xf32>
      %88 = arith.select %85, %87, %83 : vector<8x256xi1>, vector<8x256xf32>
      %cst_29 = arith.constant 4.000000e+00 : f32
      %89 = vector.broadcast %cst_29 : f32 to vector<8x256xf32>
      %90 = arith.subf %89, %88 : vector<8x256xf32>
      %91 = arith.minimumf %88, %90 : vector<8x256xf32>
      %cst_30 = arith.constant 0.000000e+00 : f32
      %cst_31 = arith.constant 1.000000e+00 : f32
      %92 = vector.broadcast %cst_30 : f32 to vector<8x256xf32>
      %93 = arith.maximumf %92, %91 : vector<8x256xf32>
      %94 = vector.broadcast %cst_31 : f32 to vector<8x256xf32>
      %95 = arith.minimumf %94, %93 : vector<8x256xf32>
      %96 = arith.mulf %78, %95 : vector<8x256xf32>
      %97 = arith.subf %67, %96 : vector<8x256xf32>
      %cst_32 = arith.constant 3.000000e+00 : f32
      %98 = vector.broadcast %cst_32 : f32 to vector<8x256xf32>
      %99 = arith.addf %98, %81 : vector<8x256xf32>
      %cst_33 = arith.constant 6.000000e+00 : f32
      %100 = vector.broadcast %cst_33 : f32 to vector<8x256xf32>
      %101 = arith.cmpf oge, %99, %100 : vector<8x256xf32>
      %cst_34 = arith.constant 6.000000e+00 : f32
      %102 = vector.broadcast %cst_34 : f32 to vector<8x256xf32>
      %103 = arith.subf %99, %102 : vector<8x256xf32>
      %104 = arith.select %101, %103, %99 : vector<8x256xi1>, vector<8x256xf32>
      %cst_35 = arith.constant 4.000000e+00 : f32
      %105 = vector.broadcast %cst_35 : f32 to vector<8x256xf32>
      %106 = arith.subf %105, %104 : vector<8x256xf32>
      %107 = arith.minimumf %104, %106 : vector<8x256xf32>
      %cst_36 = arith.constant 0.000000e+00 : f32
      %cst_37 = arith.constant 1.000000e+00 : f32
      %108 = vector.broadcast %cst_36 : f32 to vector<8x256xf32>
      %109 = arith.maximumf %108, %107 : vector<8x256xf32>
      %110 = vector.broadcast %cst_37 : f32 to vector<8x256xf32>
      %111 = arith.minimumf %110, %109 : vector<8x256xf32>
      %112 = arith.mulf %78, %111 : vector<8x256xf32>
      %113 = arith.subf %67, %112 : vector<8x256xf32>
      %cst_38 = arith.constant 1.000000e+00 : f32
      %114 = vector.broadcast %cst_38 : f32 to vector<8x256xf32>
      %115 = arith.addf %114, %81 : vector<8x256xf32>
      %cst_39 = arith.constant 6.000000e+00 : f32
      %116 = vector.broadcast %cst_39 : f32 to vector<8x256xf32>
      %117 = arith.cmpf oge, %115, %116 : vector<8x256xf32>
      %cst_40 = arith.constant 6.000000e+00 : f32
      %118 = vector.broadcast %cst_40 : f32 to vector<8x256xf32>
      %119 = arith.subf %115, %118 : vector<8x256xf32>
      %120 = arith.select %117, %119, %115 : vector<8x256xi1>, vector<8x256xf32>
      %cst_41 = arith.constant 4.000000e+00 : f32
      %121 = vector.broadcast %cst_41 : f32 to vector<8x256xf32>
      %122 = arith.subf %121, %120 : vector<8x256xf32>
      %123 = arith.minimumf %120, %122 : vector<8x256xf32>
      %cst_42 = arith.constant 0.000000e+00 : f32
      %cst_43 = arith.constant 1.000000e+00 : f32
      %124 = vector.broadcast %cst_42 : f32 to vector<8x256xf32>
      %125 = arith.maximumf %124, %123 : vector<8x256xf32>
      %126 = vector.broadcast %cst_43 : f32 to vector<8x256xf32>
      %127 = arith.minimumf %126, %125 : vector<8x256xf32>
      %128 = arith.mulf %78, %127 : vector<8x256xf32>
      %129 = arith.subf %67, %128 : vector<8x256xf32>
      %cst_44 = arith.constant 1.000000e+00 : f32
      %130 = vector.broadcast %cst_44 : f32 to vector<8x256xf32>
      %131 = arith.cmpf oge, %71, %130 : vector<8x256xf32>
      %132 = arith.select %131, %79, %97 : vector<8x256xi1>, vector<8x256xf32>
      %133 = arith.select %131, %79, %113 : vector<8x256xi1>, vector<8x256xf32>
      %134 = arith.select %131, %79, %129 : vector<8x256xi1>, vector<8x256xf32>
      %cst_45 = arith.constant 1.000000e+00 : f32
      %135 = vector.broadcast %cst_45 : f32 to vector<256x1xf32>
      %cst_46 = arith.constant dense<0.000000e+00> : vector<8x1xf32>
      %136 = tpu.matmul %132, %135, %cst_46 {dimension_numbers = #tpu.dot_dimension_numbers<[1], [0], [0], [1], [0, 0, 1, 1], [], []>} : vector<8x256xf32>, vector<256x1xf32>, vector<8x1xf32> -> vector<8x1xf32>
      %cst_47 = arith.constant 3.906250e-03 : f32
      %137 = vector.broadcast %cst_47 : f32 to vector<8x1xf32>
      %138 = arith.mulf %136, %137 : vector<8x1xf32>
      %cst_48 = arith.constant dense<0.000000e+00> : vector<8x1xf32>
      %139 = tpu.matmul %133, %135, %cst_48 {dimension_numbers = #tpu.dot_dimension_numbers<[1], [0], [0], [1], [0, 0, 1, 1], [], []>} : vector<8x256xf32>, vector<256x1xf32>, vector<8x1xf32> -> vector<8x1xf32>
      %cst_49 = arith.constant 3.906250e-03 : f32
      %140 = vector.broadcast %cst_49 : f32 to vector<8x1xf32>
      %141 = arith.mulf %139, %140 : vector<8x1xf32>
      %cst_50 = arith.constant dense<0.000000e+00> : vector<8x1xf32>
      %142 = tpu.matmul %134, %135, %cst_50 {dimension_numbers = #tpu.dot_dimension_numbers<[1], [0], [0], [1], [0, 0, 1, 1], [], []>} : vector<8x256xf32>, vector<256x1xf32>, vector<8x1xf32> -> vector<8x1xf32>
      %cst_51 = arith.constant 3.906250e-03 : f32
      %143 = vector.broadcast %cst_51 : f32 to vector<8x1xf32>
      %144 = arith.mulf %142, %143 : vector<8x1xf32>
      %145 = vector.broadcast %138 : vector<8x1xf32> to vector<8x256xf32>
      %146 = arith.subf %132, %145 : vector<8x256xf32>
      %147 = vector.broadcast %4 : vector<8x1xf32> to vector<8x256xf32>
      %148 = arith.mulf %146, %147 : vector<8x256xf32>
      %149 = vector.broadcast %138 : vector<8x1xf32> to vector<8x256xf32>
      %150 = arith.addf %148, %149 : vector<8x256xf32>
      %cst_52 = arith.constant 0.000000e+00 : f32
      %cst_53 = arith.constant 1.000000e+00 : f32
      %151 = vector.broadcast %cst_52 : f32 to vector<8x256xf32>
      %152 = arith.maximumf %151, %150 : vector<8x256xf32>
      %153 = vector.broadcast %cst_53 : f32 to vector<8x256xf32>
      %154 = arith.minimumf %153, %152 : vector<8x256xf32>
      %155 = vector.broadcast %141 : vector<8x1xf32> to vector<8x256xf32>
      %156 = arith.subf %133, %155 : vector<8x256xf32>
      %157 = vector.broadcast %4 : vector<8x1xf32> to vector<8x256xf32>
      %158 = arith.mulf %156, %157 : vector<8x256xf32>
      %159 = vector.broadcast %141 : vector<8x1xf32> to vector<8x256xf32>
      %160 = arith.addf %158, %159 : vector<8x256xf32>
      %cst_54 = arith.constant 0.000000e+00 : f32
      %cst_55 = arith.constant 1.000000e+00 : f32
      %161 = vector.broadcast %cst_54 : f32 to vector<8x256xf32>
      %162 = arith.maximumf %161, %160 : vector<8x256xf32>
      %163 = vector.broadcast %cst_55 : f32 to vector<8x256xf32>
      %164 = arith.minimumf %163, %162 : vector<8x256xf32>
      %165 = vector.broadcast %144 : vector<8x1xf32> to vector<8x256xf32>
      %166 = arith.subf %134, %165 : vector<8x256xf32>
      %167 = vector.broadcast %4 : vector<8x1xf32> to vector<8x256xf32>
      %168 = arith.mulf %166, %167 : vector<8x256xf32>
      %169 = vector.broadcast %144 : vector<8x1xf32> to vector<8x256xf32>
      %170 = arith.addf %168, %169 : vector<8x256xf32>
      %cst_56 = arith.constant 0.000000e+00 : f32
      %cst_57 = arith.constant 1.000000e+00 : f32
      %171 = vector.broadcast %cst_56 : f32 to vector<8x256xf32>
      %172 = arith.maximumf %171, %170 : vector<8x256xf32>
      %173 = vector.broadcast %cst_57 : f32 to vector<8x256xf32>
      %174 = arith.minimumf %173, %172 : vector<8x256xf32>
      %c0_58 = arith.constant 0 : index
      %c0_59 = arith.constant 0 : index
      %175 = vector.load %arg3[%c0_58, %c0_59] : memref<8x768xf32, #tpu.memory_space<vmem>>, vector<8x256xf32>
      %176 = vector.shape_cast %7 : vector<8x1xi1> to vector<8x1xi1>
      %177 = vector.broadcast %176 : vector<8x1xi1> to vector<8x256xi1>
      %178 = arith.select %177, %154, %175 : vector<8x256xi1>, vector<8x256xf32>
      %c0_60 = arith.constant 0 : index
      %c0_61 = arith.constant 0 : index
      %179 = vector.load %arg4[%c0_60, %c0_61] : memref<8x768xf32, #tpu.memory_space<vmem>>, vector<8x256xf32>
      tpu.vector_store %arg4[%c0_60, %c0_61], %178 {strides = array<i32>} : memref<8x768xf32, #tpu.memory_space<vmem>>, vector<8x256xf32>,
      %c0_62 = arith.constant 0 : index
      %c256_63 = arith.constant 256 : index
      %180 = vector.load %arg3[%c0_62, %c256_63] : memref<8x768xf32, #tpu.memory_space<vmem>>, vector<8x256xf32>
      %181 = vector.shape_cast %7 : vector<8x1xi1> to vector<8x1xi1>
      %182 = vector.broadcast %181 : vector<8x1xi1> to vector<8x256xi1>
      %183 = arith.select %182, %164, %180 : vector<8x256xi1>, vector<8x256xf32>
      %c0_64 = arith.constant 0 : index
      %c256_65 = arith.constant 256 : index
      %184 = vector.load %arg4[%c0_64, %c256_65] : memref<8x768xf32, #tpu.memory_space<vmem>>, vector<8x256xf32>
      tpu.vector_store %arg4[%c0_64, %c256_65], %183 {strides = array<i32>} : memref<8x768xf32, #tpu.memory_space<vmem>>, vector<8x256xf32>,
      %c0_66 = arith.constant 0 : index
      %c512_67 = arith.constant 512 : index
      %185 = vector.load %arg3[%c0_66, %c512_67] : memref<8x768xf32, #tpu.memory_space<vmem>>, vector<8x256xf32>
      %186 = vector.shape_cast %7 : vector<8x1xi1> to vector<8x1xi1>
      %187 = vector.broadcast %186 : vector<8x1xi1> to vector<8x256xi1>
      %188 = arith.select %187, %174, %185 : vector<8x256xi1>, vector<8x256xf32>
      %c0_68 = arith.constant 0 : index
      %c512_69 = arith.constant 512 : index
      %189 = vector.load %arg4[%c0_68, %c512_69] : memref<8x768xf32, #tpu.memory_space<vmem>>, vector<8x256xf32>
      tpu.vector_store %arg4[%c0_68, %c512_69], %188 {strides = array<i32>} : memref<8x768xf32, #tpu.memory_space<vmem>>, vector<8x256xf32>,
    } else {
    }
    return
  }
  func.func @transform_0(%arg0: i32) -> i32 {
    %c0_i32 = arith.constant 0 : i32
    %c0_i32_0 = arith.constant 0 : i32
    return %c0_i32 : i32
  }
  func.func @transform_1(%arg0: i32) -> (i32, i32) {
    %c0_i32 = arith.constant 0 : i32
    %c0_i32_0 = arith.constant 0 : i32
    return %arg0, %c0_i32 : i32, i32
  }
  func.func @transform_2(%arg0: i32) -> (i32, i32) {
    %c0_i32 = arith.constant 0 : i32
    %c0_i32_0 = arith.constant 0 : i32
    return %arg0, %c0_i32 : i32, i32
  }
  func.func @transform_3(%arg0: i32) -> (i32, i32) {
    %c0_i32 = arith.constant 0 : i32
    %c0_i32_0 = arith.constant 0 : i32
    return %arg0, %c0_i32 : i32, i32
  }
}

</mosaic_0001>

<bundles_post_ra>
// kernel: tpu_custom_call.1
= control target key start
LH: loop header
LB: loop body
LE: loop exit
PB: predicated region body
PF: predicated region fallthrough
CT: control target
= control target key end

     0   :  { %9 = vsyncpa [#allocation4], 0  ;;  %s1790_s0 = inlined_call_operand.<no memory space> [shape: f32[1], index: 0, kind: input, shape index: {}]   ;;  %s1791_s1 = inlined_call_operand.hbm [shape: f32[8,5], index: 1, kind: input, shape index: {}]   ;;  %s1792_s2 = inlined_call_operand.hbm [shape: f32[8,768], index: 2, kind: input, shape index: {}]   ;;  %s1793_s3 = inlined_call_operand.hbm [shape: f32[8,768], index: 3, kind: output, shape index: {}]  }
   0x1   :  { %10 = vsyncpa [#allocation7], 0 }
   0x2   :  { %11 = vsyncpa [#allocation5], 0  ;;  %s1310_s12 = smov [#allocation3]   ;;  %s1311_s14 = smov [#allocation6]  }
   0x3   :  { %s20_s13 = sshll.u32 %s1310_s12, 4  ;;  %s30_s15 = sshll.u32 %s1311_s14, 4  ;;  %s21_s13 = int_to_ptr.vmem [resolvable:$true] %s20_s13  ;;  %s31_s15 = int_to_ptr.vmem [resolvable:$true] %s30_s15 }
   0x4   :  { %s1252_s16 = scalar_lea.vmem %s21_s13, 128  ;;  %p1257_p1 = scmp.lt.s32.totalorder %s21_s13, %s21_s13 }
   0x5   :  { %p1253_p0 = scmp.ne.s32.totalorder %s21_s13, %s1252_s16  ;;  %p1258_p2 = scmp.lt.s32.totalorder %s1252_s16, %s1252_s16 }
   0x7   :  { %p1259_p3 = por %p1258_p2, %p1257_p1 }
   0x9   :  { %p1260_p4 = pnand %p1259_p3, %p1253_p0 }
   0xb   :  { %1263 = shalt.err (!%p1260_p4)
}
   0xc   :  { %23 = dma.hbm_to_vmem [thread:$0]  %s1791_s1, 128, %s21_s13, [#allocation4]  }
   0xd   :  { %s1272_s19 = scalar_lea.vmem %s31_s15, 768  ;;  %p1277_p6 = scmp.lt.s32.totalorder %s31_s15, %s31_s15 }
   0xe   :  { %p1273_p5 = scmp.ne.s32.totalorder %s31_s15, %s1272_s19  ;;  %p1278_p7 = scmp.lt.s32.totalorder %s1272_s19, %s1272_s19 }
  0x10   :  { %p1279_p8 = por %p1278_p7, %p1277_p6 }
  0x12   :  { %p1280_p9 = pnand %p1279_p8, %p1273_p5 }
  0x14   :  { %1283 = shalt.err (!%p1280_p9)
}
  0x15   :  { %33 = dma.hbm_to_vmem [thread:$0]  %s1792_s2, 768, %s31_s15, [#allocation7]  }
  0x16   :  { %1304 = dma.done.wait [#allocation4], 128  }
  0x17   :  { %1305 = vsyncadd [#allocation4], 4294967168 }
  0x18   :  { %1306 = dma.done.wait [#allocation7], 768  }
  0x19   :  { %1307 = vsyncadd [#allocation7], 4294966528  ;;  %p43_p10 = scmp.ge.f32.partialorder %s1790_s0, 0.5  ;;  %v1354_v0 = vld [vmem:[#allocation3] sm:$0xff] }
  0x1a   :  { %vm41_vm0 = vcmp.gt.f32.partialorder %v1354_v0, 0.5  ;;  %v1312_v1 = vmov (%p43_p10), 1.0   ;;  %v1407_v2 = vld [vmem:[#allocation6 + $0x8] sm:$0xff] (%p43_p10)  ;;  %v1418_v3 = vld [vmem:[#allocation6] sm:$0xff] (%p43_p10)  ;;  %v1425_v4 = vld [vmem:[#allocation6 + $0x18] sm:$0xff] (%p43_p10)  ;;  %v1313_v8 = vmov (%p43_p10), 0  }
  0x1b   :  { %46 = sbr.rel (!%p43_p10) target bundleno = 487 (0x1e7), region = 25  ;;  %991 = vmatprep.subr.mxu0 (%p43_p10), %v1312_v1  ;;  %1026 = vmatprep.subr.mxu1 (%p43_p10), %v1312_v1  ;;  %v1429_v5 = vld [vmem:[#allocation6 + $0x10] sm:$0xff] (%p43_p10)  ;;  %v1433_v6 = vld [vmem:[#allocation6 + $0x28] sm:$0xff] (%p43_p10)  ;;  %v1466_v7 = vld [vmem:[#allocation6 + $0x20] sm:$0xff] (%p43_p10)  ;;  %v1314_v9 = vmov (%p43_p10), 3   ;;  %v1315_v18 = vmov (%p43_p10), 1  }
  0x1c   :  { %992 = vmatpush3.msra.mxu0 (%p43_p10), %v1312_v1  ;;  %1027 = vmatpush3.msra.mxu1 (%p43_p10), %v1312_v1  ;;  %v482_v19 = vsel (%p43_p10), %vm41_vm0, 1, %v1313_v8  ;;  %v1316_v20 = vmov (%p43_p10), 4   ;;  %v1317_v25 = vmov (%p43_p10), 2  }
  0x1d   :  { %993 = vmatprep.subr.mxu0 (%p43_p10), %v1312_v1  ;;  %1028 = vmatprep.subr.mxu1 (%p43_p10), %v1312_v1 }
  0x1e   :  { %994 = vmatpush3.msra.mxu0 (%p43_p10), %v1312_v1  ;;  %1029 = vmatpush3.msra.mxu1 (%p43_p10), %v1312_v1 }
  0x1f   :  { %995 = vmatprep.subr.mxu0 (%p43_p10), %v1312_v1  ;;  %1030 = vmatprep.subr.mxu1 (%p43_p10), %v1312_v1 }
  0x20   :  { %996 = vmatpush3.msra.mxu0 %v1312_v1  ;;  %1031 = vmatpush3.msra.mxu1 %v1312_v1 }
  0x21   :  { %997 = vmatprep.subr.mxu0 %v1312_v1  ;;  %1032 = vmatprep.subr.mxu1 %v1312_v1 }
  0x22   :  { %998 = vmatpush3.msra.mxu0 %v1312_v1  ;;  %1033 = vmatpush3.msra.mxu1 %v1312_v1 }
  0x23   :  { %999 = vmatprep.subr.mxu0 %v1312_v1  ;;  %1034 = vmatprep.subr.mxu1 %v1312_v1 }
  0x24   :  { %1000 = vmatpush3.msra.mxu0 %v1312_v1  ;;  %1035 = vmatpush3.msra.mxu1 %v1312_v1 }
  0x25   :  { %1001 = vmatprep.subr.mxu0 %v1312_v1  ;;  %1036 = vmatprep.subr.mxu1 %v1312_v1 }
  0x26   :  { %1002 = vmatpush3.msra.mxu0 %v1312_v1  ;;  %1037 = vmatpush3.msra.mxu1 %v1312_v1 }
  0x27   :  { %1003 = vmatprep.subr.mxu0 %v1312_v1  ;;  %1038 = vmatprep.subr.mxu1 %v1312_v1 }
  0x28   :  { %1004 = vmatpush3.msra.mxu0 %v1312_v1  ;;  %1039 = vmatpush3.msra.mxu1 %v1312_v1 }
  0x29   :  { %1005 = vmatprep.subr.mxu0 %v1312_v1  ;;  %1040 = vmatprep.subr.mxu1 %v1312_v1 }
  0x2a   :  { %1006 = vmatpush3.msra.mxu0 %v1312_v1  ;;  %1041 = vmatpush3.msra.mxu1 %v1312_v1 }
  0x2b   :  { %1007 = vmatprep.subr.mxu0 %v1312_v1  ;;  %1042 = vmatprep.subr.mxu1 %v1312_v1 }
  0x2c   :  { %1008 = vmatpush3.msra.mxu0 %v1312_v1  ;;  %1043 = vmatpush3.msra.mxu1 %v1312_v1 }
  0x2d   :  { %1009 = vmatprep.subr.mxu0 %v1312_v1  ;;  %1044 = vmatprep.subr.mxu1 %v1312_v1 }
  0x2e   :  { %1010 = vmatpush3.msra.mxu0 %v1312_v1  ;;  %1045 = vmatpush3.msra.mxu1 %v1312_v1 }
  0x2f   :  { %1011 = vmatprep.subr.mxu0 %v1312_v1  ;;  %1046 = vmatprep.subr.mxu1 %v1312_v1 }
  0x30   :  { %1012 = vmatpush3.msra.mxu0 %v1312_v1  ;;  %1047 = vmatpush3.msra.mxu1 %v1312_v1 }
  0x31   :  { %1013 = vmatprep.subr.mxu0 %v1312_v1  ;;  %1048 = vmatprep.subr.mxu1 %v1312_v1 }
  0x32   :  { %1014 = vmatpush3.msra.mxu0 %v1312_v1  ;;  %1049 = vmatpush3.msra.mxu1 %v1312_v1 }
  0x33   :  { %1015 = vmatprep.subr.mxu0 %v1312_v1  ;;  %1050 = vmatprep.subr.mxu1 %v1312_v1 }
  0x34   :  { %1016 = vmatpush3.msra.mxu0 %v1312_v1  ;;  %1051 = vmatpush3.msra.mxu1 %v1312_v1 }
  0x35   :  { %1017 = vmatprep.subr.mxu0 %v1312_v1  ;;  %1052 = vmatprep.subr.mxu1 %v1312_v1 }
  0x36   :  { %1018 = vmatpush3.msra.mxu0 %v1312_v1  ;;  %117 = vmatprep.mubr.f32.mxu0 %v1407_v2 }
  0x37   :  { %1019 = vmatprep.subr.mxu0 %v1312_v1  ;;  %1053 = vmatpush3.msra.mxu1 %v1312_v1 }
  0x38   :  { %1020 = vmatpush3.msra.mxu0 %v1312_v1  ;;  %1054 = vmatprep.subr.mxu1 %v1312_v1 }
  0x39   :  { %1021 = vmatprep.subr.mxu0 %v1312_v1  ;;  %1055 = vmatpush3.msra.mxu1 %v1312_v1 }
  0x3a   :  { %1022 = vmatpush3.msra.mxu0 %v1312_v1  ;;  %1056 = vmatprep.subr.mxu1 %v1312_v1 }
  0x3b   :  { %118 = vmatmul.mubr.f32.vlgmr.msra.gmra.mxu0 %v1418_v3  ;;  %1061 = vmatprep.subr.mxu0 %v1312_v1 }
  0x3c   :  { %1062 = vmatpush3.msra.mxu0 %v1312_v1  ;;  %1057 = vmatpush3.msra.mxu1 %v1312_v1 }
  0x3d   :  { %1063 = vmatprep.subr.mxu0 %v1312_v1  ;;  %188 = vmatprep.mubr.f32.mxu1 %v1425_v4 }
  0x3e   :  { %1064 = vmatpush3.msra.mxu0 %v1312_v1  ;;  %189 = vmatmul.mubr.f32.vlgmr.msra.gmra.mxu1 %v1429_v5 }
  0x3f   :  { %1065 = vmatprep.subr.mxu0 %v1312_v1  ;;  %259 = vmatprep.mubr.f32.mxu0 %v1433_v6 }
  0x40   :  { %1066 = vmatpush3.msra.mxu0 %v1312_v1  ;;  %1216 = vset.pattern.permute.xlu0 %v1313_v8 }
  0x41   :  { %1067 = vmatprep.subr.mxu0 %v1312_v1  ;;  %1217 = vset.pattern.permute.xlu1 %v1314_v9 }
  0x42   :  { %1068 = vmatpush3.msra.mxu0 %v1312_v1  ;;  %275 = vperm.xlu1 %1217, %v1354_v0  }
  0x43   :  { %1069 = vmatprep.subr.mxu0 %v1312_v1 }
  0x44   :  { %1070 = vmatpush3.msra.mxu0 %v1312_v1 }
  0x45   :  { %1071 = vmatprep.subr.mxu0 %v1312_v1 }
  0x46   :  { %1072 = vmatpush3.msra.mxu0 %v1312_v1  ;;  %1218 = vset.pattern.permute.xlu1 %v1313_v8 }
  0x47   :  { %1073 = vmatprep.subr.mxu0 %v1312_v1 }
  0x48   :  { %1074 = vmatpush3.msra.mxu0 %v1312_v1 }
  0x49   :  { %1075 = vmatprep.subr.mxu0 %v1312_v1 }
  0x4a   :  { %1076 = vmatpush3.msra.mxu0 %v1312_v1 }
  0x4b   :  { %1077 = vmatprep.subr.mxu0 %v1312_v1 }
  0x4c   :  { %1078 = vmatpush3.msra.mxu0 %v1312_v1 }
  0x4d   :  { %1079 = vmatprep.subr.mxu0 %v1312_v1 }
  0x4e   :  { %1080 = vmatpush3.msra.mxu0 %v1312_v1 }
  0x4f   :  { %1081 = vmatprep.subr.mxu0 %v1312_v1 }
  0x50   :  { %1082 = vmatpush3.msra.mxu0 %v1312_v1 }
  0x51   :  { %1083 = vmatprep.subr.mxu0 %v1312_v1 }
  0x52   :  { %1084 = vmatpush3.msra.mxu0 %v1312_v1 }
  0x53   :  { %1085 = vmatprep.subr.mxu0 %v1312_v1 }
  0x54   :  { %1086 = vmatpush3.msra.mxu0 %v1312_v1 }
  0x55   :  { %1087 = vmatprep.subr.mxu0 %v1312_v1 }
  0x56   :  { %1088 = vmatpush3.msra.mxu0 %v1312_v1 }
  0x57   :  { %1089 = vmatprep.subr.mxu0 %v1312_v1 }
  0x58   :  { %1090 = vmatpush3.msra.mxu0 %v1312_v1 }
  0x59   :  { %1091 = vmatprep.subr.mxu0 %v1312_v1 }
  0x5a   :  { %1092 = vmatpush3.msra.mxu0 %v1312_v1 }
  0x5b   :  { %260 = vmatmul.mubr.f32.vlgmr.msra.gmra.mxu0 %v1466_v7 }
  0xbd   :  { %v276_v32 = vpop.permute.xlu1 %275 }
  0xfb   :  { %v1023_v10 = vpop.f32.mrf.mxu0 }
  0xfd   :  { %v1024_v11 = vpop.f32.mrf.mxu0 }
  0xfe   :  { %v1025_v12 = vadd.f32 %v1024_v11, %v1023_v10  ;;  %v1058_v13 = vpop.f32.mrf.mxu1 }
 0x100   :  { %v123_v14 = vmul.f32 0.00390625, %v1025_v12  ;;  %v1059_v15 = vpop.f32.mrf.mxu1 }
 0x101   :  { %v1060_v16 = vadd.f32 %v1059_v15, %v1058_v13 }
 0x102   :  { %268 = vperm.xlu0 %1216, %v123_v14  }
 0x103   :  { %v194_v17 = vmul.f32 0.00390625, %v1060_v16 }
 0x106   :  { %288 = vperm.xlu0 %1216, %v194_v17  }
 0x10a   :  { %1219 = vset.pattern.permute.xlu0 %v1315_v18 }
 0x10b   :  { %389 = vperm.xlu0 %1219, %v1354_v0  }
 0x10f   :  { %1221 = vset.pattern.permute.xlu0 %v1316_v20 }
 0x110   :  { %484 = vperm.xlu0 %1221, %v482_v19  }
 0x11b   :  { %v1093_v21 = vpop.f32.mrf.mxu0 }
 0x11d   :  { %v1094_v22 = vpop.f32.mrf.mxu0 }
 0x11e   :  { %v1095_v23 = vadd.f32 %v1094_v22, %v1093_v21 }
 0x120   :  { %v265_v24 = vmul.f32 0.00390625, %v1095_v23 }
 0x122   :  { %303 = vperm.xlu1 %1218, %v265_v24  }
 0x126   :  { %379 = vperm.xlu1 %1218, %v1354_v0  }
 0x12a   :  { %1220 = vset.pattern.permute.xlu1 %v1317_v25 }
 0x12b   :  { %399 = vperm.xlu1 %1220, %v1354_v0  }
 0x17d   :  { %v269_v26 = vpop.permute.xlu0 %268 }
 0x17e   :  { %v271_v30 = vsub.f32 %v1418_v3, %v269_v26  ;;  %v272_v31 = vsub.f32 %v1407_v2, %v269_v26 }
 0x180   :  { %v278_v35 = vmul.f32 %v276_v32, %v271_v30  ;;  %v279_v36 = vmul.f32 %v276_v32, %v272_v31 }
 0x181   :  { %v289_v27 = vpop.permute.xlu0 %288 }
 0x182   :  { %v291_v28 = vsub.f32 %v1429_v5, %v289_v27  ;;  %v292_v29 = vsub.f32 %v1425_v4, %v289_v27  ;;  %v280_v39 = vadd.f32 %v278_v35, %v269_v26  ;;  %v281_v40 = vadd.f32 %v279_v36, %v269_v26 }
 0x184   :  { %v293_v33 = vmul.f32 %v291_v28, %v276_v32  ;;  %v294_v34 = vmul.f32 %v292_v29, %v276_v32  ;;  %v282_v46 = vmax.f32 %v280_v39, 0.0  ;;  %v283_v47 = vmax.f32 %v281_v40, 0.0 }
 0x186   :  { %v295_v37 = vadd.f32 %v293_v33, %v289_v27  ;;  %v296_v38 = vadd.f32 %v294_v34, %v289_v27  ;;  %v284_v54 = vmin.f32 %v282_v46, 1.0  ;;  %v285_v55 = vmin.f32 %v283_v47, 1.0 }
 0x188   :  { %v297_v41 = vmax.f32 %v295_v37, 0.0  ;;  %v298_v42 = vmax.f32 %v296_v38, 0.0 }
 0x18a   :  { %v1483_v50 = vmin.f32 %v297_v41, 1.0  ;;  %v1485_v51 = vmin.f32 %v298_v42, 1.0 }
 0x18c   :  { %v316_v58 = vmax.f32 %v284_v54, %v1483_v50  ;;  %v317_v59 = vmax.f32 %v285_v55, %v1485_v51  ;;  %v320_v62 = vmin.f32 %v284_v54, %v1483_v50  ;;  %v321_v63 = vmin.f32 %v285_v55, %v1485_v51 }
 0x18d   :  { %v346_v19 = vsub.f32 %v284_v54, %v1483_v50  ;;  %v347_v26 = vsub.f32 %v285_v55, %v1485_v51 }
 0x19d   :  { %v304_v43 = vpop.permute.xlu1 %303 }
 0x19e   :  { %v306_v44 = vsub.f32 %v1466_v7, %v304_v43  ;;  %v307_v45 = vsub.f32 %v1433_v6, %v304_v43 }
 0x1a0   :  { %v308_v48 = vmul.f32 %v306_v44, %v276_v32  ;;  %v309_v49 = vmul.f32 %v307_v45, %v276_v32 }
 0x1a1   :  { %v380_v35 = vpop.permute.xlu1 %379 }
 0x1a2   :  { %v310_v52 = vadd.f32 %v308_v48, %v304_v43  ;;  %v311_v53 = vadd.f32 %v309_v49, %v304_v43 }
 0x1a4   :  { %v312_v56 = vmax.f32 %v310_v52, 0.0  ;;  %v313_v57 = vmax.f32 %v311_v53, 0.0  ;;  %v390_v53 = vpop.permute.xlu0 %389 }
 0x1a6   :  { %v314_v60 = vmin.f32 %v312_v56, 1.0  ;;  %v315_v61 = vmin.f32 %v313_v57, 1.0  ;;  %v400_v49 = vpop.permute.xlu1 %399 }
 0x1a8   :  { %v1491_v1 = vmax.f32 %v316_v58, %v314_v60  ;;  %v1493_v8 = vmax.f32 %v317_v59, %v315_v61  ;;  %v322_v9 = vmin.f32 %v320_v62, %v314_v60  ;;  %v323_v10 = vmin.f32 %v321_v63, %v315_v61 }
 0x1a9   :  { %v330_v17 = vsub.f32 %v1483_v50, %v314_v60  ;;  %v340_v18 = vsub.f32 %v314_v60, %v284_v54  ;;  %v331_v21 = vsub.f32 %v1485_v51, %v315_v61  ;;  %v341_v22 = vsub.f32 %v315_v61, %v285_v55 }
 0x1aa   :  { %v324_v11 = vsub.f32 %v1491_v1, %v322_v9  ;;  %v325_v12 = vsub.f32 %v1493_v8, %v323_v10  ;;  %v370_v15 = vadd.f32 1e-08, %v1491_v1  ;;  %v371_v16 = vadd.f32 1e-08, %v1493_v8 }
 0x1ab   :  { %vm352_vm1 = vcmp.eq.f32.partialorder %v1491_v1, %v284_v54  ;;  %vm353_vm3 = vcmp.eq.f32.partialorder %v1493_v8, %v285_v55  ;;  %vm356_vm5 = vcmp.eq.f32.partialorder %v1491_v1, %v1483_v50  ;;  %vm357_vm6 = vcmp.eq.f32.partialorder %v1493_v8, %v1485_v51 }
 0x1ac   :  { %v326_v13 = vadd.f32 1e-08, %v324_v11  ;;  %v327_v14 = vadd.f32 1e-08, %v325_v12  ;;  %vm360_vm7 = vcmp.eq.f32.partialorder %v1491_v1, %v314_v60  ;;  %vm361_vm8 = vcmp.eq.f32.partialorder %v1493_v8, %v315_v61 }
 0x1ad   :  { %vm364_vm9 = vcmp.eq.f32.partialorder %v1491_v1, 0.0  ;;  %vm365_vm10 = vcmp.eq.f32.partialorder %v1493_v8, 0.0  ;;  %v382_v61 = vmul.f32 %v380_v35, %v1491_v1  ;;  %v383_v9 = vmul.f32 %v380_v35, %v1493_v8 }
 0x1ae   :  { %1222 = vrcp.f32 %v326_v13 }
 0x1af   :  { %1224 = vrcp.f32 %v327_v14 }
 0x1b0   :  { %1226 = vrcp.f32 %v370_v15 }
 0x1b1   :  { %1228 = vrcp.f32 %v371_v16  ;;  %v384_v16 = vmax.f32 %v382_v61, 0.0 }
 0x1bb   :  { %v1223_v20 = vpop.eup %1222 }
 0x1bc   :  { %v1225_v23 = vpop.eup %1224  ;;  %v332_v24 = vmul.f32 %v1223_v20, %v330_v17  ;;  %v342_v25 = vmul.f32 %v1223_v20, %v340_v18  ;;  %v348_v27 = vmul.f32 %v1223_v20, %v346_v19  ;;  %v385_v17 = vmax.f32 %v383_v9, 0.0 }
 0x1bd   :  { %v1227_v28 = vpop.eup %1226  ;;  %v333_v29 = vmul.f32 %v1225_v23, %v331_v21  ;;  %v343_v30 = vmul.f32 %v1225_v23, %v341_v22  ;;  %v349_v33 = vmul.f32 %v1225_v23, %v347_v26 }
 0x1be   :  { %v1229_v31 = vpop.eup %1228  ;;  %vm334_vm2 = vcmp.lt.f32.partialorder %v332_v24, 0.0  ;;  %v336_v32 = vadd.f32 6.0, %v332_v24  ;;  %v344_v37 = vadd.f32 2.0, %v342_v25  ;;  %v350_v38 = vadd.f32 4.0, %v348_v27 }
 0x1bf   :  { %vm335_vm4 = vcmp.lt.f32.partialorder %v333_v29, 0.0  ;;  %v337_v34 = vadd.f32 6.0, %v333_v29  ;;  %v374_v39 = vmul.f32 %v1227_v28, %v324_v11  ;;  %v345_v41 = vadd.f32 2.0, %v343_v30 }
 0x1c0   :  { %v338_v36 = vsel %vm334_vm2, %v336_v32, %v332_v24  ;;  %v375_v43 = vmul.f32 %v1229_v31, %v325_v12  ;;  %v351_v44 = vadd.f32 4.0, %v349_v33 }
 0x1c1   :  { %v339_v40 = vsel %vm335_vm4, %v337_v34, %v333_v29  ;;  %v354_v42 = vsel %vm352_vm1, %v338_v36, 0.0  ;;  %v376_v52 = vsel %vm364_vm9, 0.0, %v374_v39  ;;  %v386_v39 = vmin.f32 %v384_v16, 1.0 }
 0x1c2   :  { %v355_v45 = vsel %vm353_vm3, %v339_v40, 0.0  ;;  %v358_v46 = vsel %vm356_vm5, %v344_v37, %v354_v42  ;;  %v377_v55 = vsel %vm365_vm10, 0.0, %v375_v43  ;;  %v402_v58 = vmul.f32 %v400_v49, %v376_v52 }
 0x1c3   :  { %v359_v47 = vsel %vm357_vm6, %v345_v41, %v355_v45  ;;  %v362_v48 = vsel %vm360_vm7, %v350_v38, %v358_v46  ;;  %v403_v60 = vmul.f32 %v400_v49, %v377_v55  ;;  %v387_v40 = vmin.f32 %v385_v17, 1.0 }
 0x1c4   :  { %v363_v50 = vsel %vm361_vm8, %v351_v44, %v359_v47  ;;  %v366_v51 = vsel %vm364_vm9, 0.0, %v362_v48  ;;  %v404_v11 = vmax.f32 %v402_v58, 0.0 }
 0x1c5   :  { %v367_v54 = vsel %vm365_vm10, 0.0, %v363_v50  ;;  %v368_v56 = vmul.f32 0.16666667, %v366_v51  ;;  %v405_v13 = vmax.f32 %v403_v60, 0.0  ;;  %v485_v51 = vpop.permute.xlu0 %484 }
 0x1c6   :  { %v369_v57 = vmul.f32 0.16666667, %v367_v54  ;;  %v406_v19 = vmin.f32 %v404_v11, 1.0  ;;  %vm486_vm2 = vcmp.eq.s32.totalorder %v485_v51, 1 }
 0x1c7   :  { %v392_v59 = vadd.f32 %v390_v53, %v368_v56  ;;  %v407_v1 = vmin.f32 %v405_v13, 1.0 }
 0x1c8   :  { %v393_v62 = vadd.f32 %v390_v53, %v369_v57  ;;  %v408_v52 = vmul.f32 %v406_v19, %v386_v39 }
 0x1c9   :  { %v394_v63 = vfloor.f32 %v392_v59  ;;  %v409_v53 = vmul.f32 %v407_v1, %v387_v40 }
 0x1ca   :  { %v395_v10 = vfloor.f32 %v393_v62  ;;  %v410_v11 = vsub.f32 %v386_v39, %v408_v52 }
 0x1cb   :  { %v1517_v12 = vsub.f32 %v392_v59, %v394_v63  ;;  %v411_v13 = vsub.f32 %v387_v40, %v409_v53 }
 0x1cc   :  { %v1519_v14 = vsub.f32 %v393_v62, %v395_v10 }
 0x1cd   :  { %v412_v15 = vmul.f32 6.0, %v1517_v12  ;;  %vm474_vm3 = vcmp.ge.f32.partialorder %v1517_v12, 1.0 }
 0x1ce   :  { %v413_v18 = vmul.f32 6.0, %v1519_v14  ;;  %vm475_vm4 = vcmp.ge.f32.partialorder %v1519_v14, 1.0 }
 0x1cf   :  { %v414_v20 = vadd.f32 5.0, %v412_v15  ;;  %v434_v21 = vadd.f32 3.0, %v412_v15  ;;  %v454_v22 = vadd.f32 1.0, %v412_v15 }
 0x1d0   :  { %v415_v23 = vadd.f32 5.0, %v413_v18  ;;  %v435_v8 = vadd.f32 3.0, %v413_v18  ;;  %v455_v24 = vadd.f32 1.0, %v413_v18 }
 0x1d1   :  { %vm416_vm11 = vcmp.ge.f32.partialorder %v414_v20, 6.0  ;;  %v979_v25 = vadd.f32 -6.0, %v414_v20  ;;  %vm436_vm12 = vcmp.ge.f32.partialorder %v434_v21, 6.0  ;;  %v981_v26 = vadd.f32 -6.0, %v434_v21 }
 0x1d2   :  { %vm417_vm13 = vcmp.ge.f32.partialorder %v415_v23, 6.0  ;;  %v980_v27 = vadd.f32 -6.0, %v415_v23  ;;  %vm437_vm14 = vcmp.ge.f32.partialorder %v435_v8, 6.0  ;;  %v982_v28 = vadd.f32 -6.0, %v435_v8 }
 0x1d3   :  { %v420_v29 = vsel %vm416_vm11, %v979_v25, %v414_v20  ;;  %v440_v30 = vsel %vm436_vm12, %v981_v26, %v434_v21  ;;  %vm456_vm15 = vcmp.ge.f32.partialorder %v454_v22, 6.0  ;;  %vm457_vm1 = vcmp.ge.f32.partialorder %v455_v24, 6.0 }
 0x1d4   :  { %v421_v31 = vsel %vm417_vm13, %v980_v27, %v415_v23  ;;  %v422_v32 = vsub.f32 4.0, %v420_v29  ;;  %v441_v33 = vsel %vm437_vm14, %v982_v28, %v435_v8  ;;  %v442_v34 = vsub.f32 4.0, %v440_v30 }
 0x1d5   :  { %v423_v35 = vsub.f32 4.0, %v421_v31  ;;  %v443_v36 = vsub.f32 4.0, %v441_v33  ;;  %v983_v37 = vadd.f32 -6.0, %v454_v22  ;;  %v984_v38 = vadd.f32 -6.0, %v455_v24 }
 0x1d6   :  { %v424_v41 = vmin.f32 %v420_v29, %v422_v32  ;;  %v444_v42 = vmin.f32 %v440_v30, %v442_v34 }
 0x1d7   :  { %v425_v43 = vmin.f32 %v421_v31, %v423_v35  ;;  %v445_v44 = vmin.f32 %v441_v33, %v443_v36  ;;  %v460_v45 = vsel %vm456_vm15, %v983_v37, %v454_v22  ;;  %v461_v46 = vsel %vm457_vm1, %v984_v38, %v455_v24 }
 0x1d8   :  { %v426_v47 = vmax.f32 %v424_v41, 0.0  ;;  %v446_v48 = vmax.f32 %v444_v42, 0.0  ;;  %v462_v49 = vsub.f32 4.0, %v460_v45  ;;  %v463_v50 = vsub.f32 4.0, %v461_v46 }
 0x1d9   :  { %v427_v54 = vmax.f32 %v425_v43, 0.0  ;;  %v447_v55 = vmax.f32 %v445_v44, 0.0 }
 0x1da   :  { %v428_v56 = vmin.f32 %v426_v47, 1.0  ;;  %v448_v57 = vmin.f32 %v446_v48, 1.0  ;;  %v464_v58 = vmin.f32 %v460_v45, %v462_v49  ;;  %v465_v59 = vmin.f32 %v461_v46, %v463_v50 }
 0x1db   :  { %v429_v60 = vmin.f32 %v427_v54, 1.0  ;;  %v449_v62 = vmin.f32 %v447_v55, 1.0 }
 0x1dc   :  { %v430_v63 = vmul.f32 %v428_v56, %v408_v52  ;;  %v450_v61 = vmul.f32 %v448_v57, %v408_v52  ;;  %v466_v9 = vmax.f32 %v464_v58, 0.0  ;;  %v467_v10 = vmax.f32 %v465_v59, 0.0 }
 0x1dd   :  { %v431_v15 = vmul.f32 %v429_v60, %v409_v53  ;;  %v451_v16 = vmul.f32 %v449_v62, %v409_v53 }
 0x1de   :  { %v432_v17 = vsub.f32 %v386_v39, %v430_v63  ;;  %v452_v18 = vsub.f32 %v386_v39, %v450_v61  ;;  %v468_v19 = vmin.f32 %v466_v9, 1.0  ;;  %v469_v20 = vmin.f32 %v467_v10, 1.0 }
 0x1df   :  { %v433_v21 = vsub.f32 %v387_v40, %v431_v15  ;;  %v453_v22 = vsub.f32 %v387_v40, %v451_v16 }
 0x1e0   :  { %v470_v1 = vmul.f32 %v468_v19, %v408_v52  ;;  %v471_v23 = vmul.f32 %v469_v20, %v409_v53  ;;  %v476_v8 = vsel %vm474_vm3, %v410_v11, %v432_v17  ;;  %v478_v24 = vsel %vm474_vm3, %v410_v11, %v452_v18 }
 0x1e1   :  { %v477_v25 = vsel %vm475_vm4, %v411_v13, %v433_v21  ;;  %v479_v26 = vsel %vm475_vm4, %v411_v13, %v453_v22  ;;  %v487_v27 = vsel %vm486_vm2, %v476_v8, %v1418_v3  ;;  %v493_v28 = vsel %vm486_vm2, %v478_v24, %v1429_v5 }
 0x1e2   :  { %v472_v29 = vsub.f32 %v386_v39, %v470_v1  ;;  %v473_v30 = vsub.f32 %v387_v40, %v471_v23  ;;  %v488_v31 = vsel %vm486_vm2, %v477_v25, %v1407_v2  ;;  %489 = vst [vmem:[#allocation8] sm:$0xff] %v487_v27  ;;  %v494_v32 = vsel %vm486_vm2, %v479_v26, %v1425_v4 }
 0x1e3   :  { %495 = vst [vmem:[#allocation8 + $0x10] sm:$0xff] %v493_v28  ;;  %490 = vst [vmem:[#allocation8 + $0x8] sm:$0xff] %v488_v31 }
 0x1e4   :  { %496 = vst [vmem:[#allocation8 + $0x18] sm:$0xff] %v494_v32  ;;  %v480_v33 = vsel %vm474_vm3, %v410_v11, %v472_v29  ;;  %v481_v3 = vsel %vm475_vm4, %v411_v13, %v473_v30 }
 0x1e5   :  { %v499_v5 = vsel %vm486_vm2, %v480_v33, %v1466_v7  ;;  %v500_v34 = vsel %vm486_vm2, %v481_v3, %v1433_v6 }
 0x1e6   :  { %501 = vst [vmem:[#allocation8 + $0x20] sm:$0xff] %v499_v5  ;;  %502 = vst [vmem:[#allocation8 + $0x28] sm:$0xff] %v500_v34 }
 0x1e7 PF:  { %p503_p11 = scmp.lt.f32.partialorder %s1790_s0, 0.5 }
 0x1e8   :  { %v1318_v2 = vmov (%p503_p11), 1   ;;  %v1319_v4 = vmov (%p503_p11), 2   ;;  %v1320_v7 = vmov (%p503_p11), 1.0   ;;  %v1321_v6 = vmov (%p503_p11), 0   ;;  %v1624_v12 = vld [vmem:[#allocation6] sm:$0xff] (%p503_p11)  ;;  %v1626_v14 = vld [vmem:[#allocation6 + $0x10] sm:$0xff] (%p503_p11) }
 0x1e9   :  { %506 = sbr.rel (!%p503_p11) target bundleno = 1008 (0x3f0), region = 29  ;;  %1230 = vset.pattern.permute.xlu0 (%p503_p11), %v1318_v2  ;;  %1232 = vset.pattern.permute.xlu1 (%p503_p11), %v1319_v4  ;;  %v1628_v35 = vld [vmem:[#allocation6 + $0x8] sm:$0xff] (%p503_p11)  ;;  %v1630_v36 = vld [vmem:[#allocation6 + $0x18] sm:$0xff] (%p503_p11)  ;;  %v513_v37 = vmax.f32 (%p503_p11), %v1624_v12, %v1626_v14  ;;  %v517_v38 = vmin.f32 (%p503_p11), %v1624_v12, %v1626_v14  ;;  %v1636_v39 = vld [vmem:[#allocation6 + $0x20] sm:$0xff] (%p503_p11)  ;;  %v543_v63 = vsub.f32 (%p503_p11), %v1624_v12, %v1626_v14 }
 0x1ea   :  { %587 = vperm.xlu0 (%p503_p11), %1230, %v1354_v0   ;;  %597 = vperm.xlu1 (%p503_p11), %1232, %v1354_v0   ;;  %v514_v40 = vmax.f32 (%p503_p11), %v1628_v35, %v1630_v36  ;;  %v518_v41 = vmin.f32 (%p503_p11), %v1628_v35, %v1630_v36  ;;  %v1642_v42 = vld [vmem:[#allocation6 + $0x28] sm:$0xff] (%p503_p11)  ;;  %v527_v52 = vsub.f32 (%p503_p11), %v1626_v14, %v1636_v39 }
 0x1eb   :  { %1096 = vmatprep.subr.mxu0 (%p503_p11), %v1320_v7  ;;  %1131 = vmatprep.subr.mxu1 (%p503_p11), %v1320_v7  ;;  %v1645_v43 = vmax.f32 (%p503_p11), %v513_v37, %v1636_v39  ;;  %v519_v44 = vmin.f32 (%p503_p11), %v517_v38, %v1636_v39  ;;  %v528_v53 = vsub.f32 (%p503_p11), %v1630_v36, %v1642_v42 }
 0x1ec   :  { %1097 = vmatpush3.msra.mxu0 (%p503_p11), %v1320_v7  ;;  %1132 = vmatpush3.msra.mxu1 (%p503_p11), %v1320_v7  ;;  %v1649_v45 = vmax.f32 (%p503_p11), %v514_v40, %v1642_v42  ;;  %v520_v46 = vmin.f32 (%p503_p11), %v518_v41, %v1642_v42  ;;  %v537_v57 = vsub.f32 (%p503_p11), %v1636_v39, %v1624_v12 }
 0x1ed   :  { %1098 = vmatprep.subr.mxu0 (%p503_p11), %v1320_v7  ;;  %1133 = vmatprep.subr.mxu1 (%p503_p11), %v1320_v7  ;;  %v521_v47 = vsub.f32 (%p503_p11), %v1645_v43, %v519_v44  ;;  %v538_v58 = vsub.f32 (%p503_p11), %v1642_v42, %v1628_v35  ;;  %v567_v59 = vadd.f32 (%p503_p11), 1e-08, %v1645_v43  ;;  %v544_v61 = vsub.f32 (%p503_p11), %v1628_v35, %v1630_v36 }
 0x1ee   :  { %1231 = vset.pattern.permute.xlu0 %v1321_v6  ;;  %1099 = vmatpush3.msra.mxu0 %v1320_v7  ;;  %v522_v48 = vsub.f32 %v1649_v45, %v520_v46  ;;  %v568_v11 = vadd.f32 1e-08, %v1649_v45  ;;  %vm549_vm7 = vcmp.eq.f32.partialorder %v1645_v43, %v1624_v12  ;;  %vm550_vm8 = vcmp.eq.f32.partialorder %v1649_v45, %v1628_v35 }
 0x1ef   :  { %577 = vperm.xlu0 %1231, %v1354_v0   ;;  %1100 = vmatprep.subr.mxu0 %v1320_v7  ;;  %v523_v49 = vadd.f32 1e-08, %v521_v47  ;;  %vm553_vm9 = vcmp.eq.f32.partialorder %v1645_v43, %v1626_v14  ;;  %vm554_vm10 = vcmp.eq.f32.partialorder %v1649_v45, %v1630_v36  ;;  %vm557_vm11 = vcmp.eq.f32.partialorder %v1645_v43, %v1636_v39 }
 0x1f0   :  { %1134 = vmatpush3.msra.mxu1 %v1320_v7  ;;  %1101 = vmatpush3.msra.mxu0 %v1320_v7  ;;  %v524_v50 = vadd.f32 1e-08, %v522_v48  ;;  %vm558_vm12 = vcmp.eq.f32.partialorder %v1649_v45, %v1642_v42  ;;  %vm561_vm13 = vcmp.eq.f32.partialorder %v1645_v43, 0.0  ;;  %vm562_vm14 = vcmp.eq.f32.partialorder %v1649_v45, 0.0 }
 0x1f1   :  { %1135 = vmatprep.subr.mxu1 %v1320_v7  ;;  %1102 = vmatprep.subr.mxu0 %v1320_v7  ;;  %1236 = vrcp.f32 %v523_v49 }
 0x1f2   :  { %1136 = vmatpush3.msra.mxu1 %v1320_v7  ;;  %1103 = vmatpush3.msra.mxu0 %v1320_v7  ;;  %1238 = vrcp.f32 %v524_v50 }
 0x1f3   :  { %1137 = vmatprep.subr.mxu1 %v1320_v7  ;;  %1104 = vmatprep.subr.mxu0 %v1320_v7  ;;  %1240 = vrcp.f32 %v567_v59 }
 0x1f4   :  { %1138 = vmatpush3.msra.mxu1 %v1320_v7  ;;  %1105 = vmatpush3.msra.mxu0 %v1320_v7  ;;  %1242 = vrcp.f32 %v568_v11 }
 0x1f5   :  { %1139 = vmatprep.subr.mxu1 %v1320_v7  ;;  %1106 = vmatprep.subr.mxu0 %v1320_v7 }
 0x1f6   :  { %1140 = vmatpush3.msra.mxu1 %v1320_v7  ;;  %1107 = vmatpush3.msra.mxu0 %v1320_v7 }
 0x1f7   :  { %1141 = vmatprep.subr.mxu1 %v1320_v7  ;;  %1108 = vmatprep.subr.mxu0 %v1320_v7 }
 0x1f8   :  { %1142 = vmatpush3.msra.mxu1 %v1320_v7  ;;  %1109 = vmatpush3.msra.mxu0 %v1320_v7 }
 0x1f9   :  { %1143 = vmatprep.subr.mxu1 %v1320_v7  ;;  %1110 = vmatprep.subr.mxu0 %v1320_v7 }
 0x1fa   :  { %1144 = vmatpush3.msra.mxu1 %v1320_v7  ;;  %1111 = vmatpush3.msra.mxu0 %v1320_v7 }
 0x1fb   :  { %1145 = vmatprep.subr.mxu1 %v1320_v7  ;;  %1112 = vmatprep.subr.mxu0 %v1320_v7 }
 0x1fc   :  { %1146 = vmatpush3.msra.mxu1 %v1320_v7  ;;  %1113 = vmatpush3.msra.mxu0 %v1320_v7 }
 0x1fd   :  { %1147 = vmatprep.subr.mxu1 %v1320_v7  ;;  %1114 = vmatprep.subr.mxu0 %v1320_v7 }
 0x1fe   :  { %1148 = vmatpush3.msra.mxu1 %v1320_v7  ;;  %1115 = vmatpush3.msra.mxu0 %v1320_v7  ;;  %v1237_v51 = vpop.eup %1236 }
 0x1ff   :  { %1149 = vmatprep.subr.mxu1 %v1320_v7  ;;  %1116 = vmatprep.subr.mxu0 %v1320_v7  ;;  %v1239_v54 = vpop.eup %1238  ;;  %v529_v55 = vmul.f32 %v1237_v51, %v527_v52  ;;  %v539_v9 = vmul.f32 %v1237_v51, %v537_v57  ;;  %v545_v16 = vmul.f32 %v1237_v51, %v543_v63 }
 0x200   :  { %1150 = vmatpush3.msra.mxu1 %v1320_v7  ;;  %1117 = vmatpush3.msra.mxu0 %v1320_v7  ;;  %v530_v56 = vmul.f32 %v1239_v54, %v528_v53  ;;  %v540_v10 = vmul.f32 %v1239_v54, %v538_v58  ;;  %v546_v17 = vmul.f32 %v1239_v54, %v544_v61  ;;  %v1241_v26 = vpop.eup %1240 }
 0x201   :  { %1151 = vmatprep.subr.mxu1 %v1320_v7  ;;  %1118 = vmatprep.subr.mxu0 %v1320_v7  ;;  %v533_v60 = vadd.f32 6.0, %v529_v55  ;;  %vm531_vm5 = vcmp.lt.f32.partialorder %v529_v55, 0.0  ;;  %v541_v18 = vadd.f32 2.0, %v539_v9  ;;  %v547_v22 = vadd.f32 4.0, %v545_v16  ;;  %v1243_v29 = vpop.eup %1242 }
 0x202   :  { %1152 = vmatpush3.msra.mxu1 %v1320_v7  ;;  %1119 = vmatpush3.msra.mxu0 %v1320_v7  ;;  %v534_v62 = vadd.f32 6.0, %v530_v56  ;;  %vm532_vm6 = vcmp.lt.f32.partialorder %v530_v56, 0.0  ;;  %v542_v19 = vadd.f32 2.0, %v540_v10  ;;  %v548_v1 = vadd.f32 4.0, %v546_v17 }
 0x203   :  { %1153 = vmatprep.subr.mxu1 %v1320_v7  ;;  %1120 = vmatprep.subr.mxu0 %v1320_v7  ;;  %v535_v13 = vsel %vm531_vm5, %v533_v60, %v529_v55  ;;  %v571_v32 = vmul.f32 %v1241_v26, %v521_v47  ;;  %v572_v3 = vmul.f32 %v1243_v29, %v522_v48 }
 0x204   :  { %1154 = vmatpush3.msra.mxu1 %v1320_v7  ;;  %1121 = vmatpush3.msra.mxu0 %v1320_v7  ;;  %v536_v15 = vsel %vm532_vm6, %v534_v62, %v530_v56  ;;  %v551_v20 = vsel %vm549_vm7, %v535_v13, 0.0 }
 0x205   :  { %1155 = vmatprep.subr.mxu1 %v1320_v7  ;;  %1122 = vmatprep.subr.mxu0 %v1320_v7  ;;  %v552_v21 = vsel %vm550_vm8, %v536_v15, 0.0  ;;  %v555_v23 = vsel %vm553_vm9, %v541_v18, %v551_v20  ;;  %v573_v4 = vsel %vm561_vm13, 0.0, %v571_v32  ;;  %v574_v40 = vsel %vm562_vm14, 0.0, %v572_v3 }
 0x206   :  { %1156 = vmatpush3.msra.mxu1 %v1320_v7  ;;  %1123 = vmatpush3.msra.mxu0 %v1320_v7  ;;  %v556_v8 = vsel %vm554_vm10, %v542_v19, %v552_v21  ;;  %v559_v24 = vsel %vm557_vm11, %v547_v22, %v555_v23 }
 0x207   :  { %1157 = vmatprep.subr.mxu1 %v1320_v7  ;;  %1124 = vmatprep.subr.mxu0 %v1320_v7  ;;  %v560_v25 = vsel %vm558_vm12, %v548_v1, %v556_v8  ;;  %v563_v27 = vsel %vm561_vm13, 0.0, %v559_v24 }
 0x208   :  { %1158 = vmatpush3.msra.mxu1 %v1320_v7  ;;  %1125 = vmatpush3.msra.mxu0 %v1320_v7  ;;  %v564_v28 = vsel %vm562_vm14, 0.0, %v560_v25  ;;  %v565_v30 = vmul.f32 0.16666667, %v563_v27 }
 0x209   :  { %1159 = vmatprep.subr.mxu1 %v1320_v7  ;;  %1126 = vmatprep.subr.mxu0 %v1320_v7  ;;  %v566_v31 = vmul.f32 0.16666667, %v564_v28 }
 0x20a   :  { %1160 = vmatpush3.msra.mxu1 %v1320_v7  ;;  %1127 = vmatpush3.msra.mxu0 %v1320_v7 }
 0x20b   :  { %1161 = vmatprep.subr.mxu1 %v1320_v7  ;;  %1166 = vmatprep.subr.mxu0 %v1320_v7 }
 0x20c   :  { %1162 = vmatpush3.msra.mxu1 %v1320_v7  ;;  %1233 = vset.pattern.permute.xlu1 %v1321_v6 }
 0x265   :  { %v588_v33 = vpop.permute.xlu0 %587  ;;  %v598_v2 = vpop.permute.xlu1 %597 }
 0x266   :  { %v590_v5 = vadd.f32 %v588_v33, %v565_v30  ;;  %v591_v34 = vadd.f32 %v588_v33, %v566_v31  ;;  %v600_v41 = vmul.f32 %v598_v2, %v573_v4  ;;  %v601_v48 = vmul.f32 %v598_v2, %v574_v40 }
 0x268   :  { %v592_v37 = vfloor.f32 %v590_v5  ;;  %v593_v38 = vfloor.f32 %v591_v34  ;;  %v602_v51 = vmax.f32 %v600_v41, 0.0  ;;  %v603_v63 = vmax.f32 %v601_v48, 0.0 }
 0x26a   :  { %v1686_v44 = vsub.f32 %v590_v5, %v592_v37  ;;  %v1688_v46 = vsub.f32 %v591_v34, %v593_v38  ;;  %v578_v49 = vpop.permute.xlu0 %577  ;;  %v604_v61 = vmin.f32 %v602_v51, 1.0  ;;  %v605_v16 = vmin.f32 %v603_v63, 1.0 }
 0x26b   :  { %v580_v52 = vmul.f32 %v578_v49, %v1645_v43  ;;  %v581_v53 = vmul.f32 %v578_v49, %v1649_v45 }
 0x26c   :  { %v610_v50 = vmul.f32 6.0, %v1686_v44  ;;  %v611_v47 = vmul.f32 6.0, %v1688_v46  ;;  %vm673_vm5 = vcmp.ge.f32.partialorder %v1688_v46, 1.0  ;;  %vm672_vm6 = vcmp.ge.f32.partialorder %v1686_v44, 1.0 }
 0x26d   :  { %v582_v9 = vmax.f32 %v580_v52, 0.0  ;;  %v583_v10 = vmax.f32 %v581_v53, 0.0 }
 0x26e   :  { %v612_v54 = vadd.f32 5.0, %v610_v50  ;;  %v613_v55 = vadd.f32 5.0, %v611_v47  ;;  %v632_v56 = vadd.f32 3.0, %v610_v50  ;;  %v633_v57 = vadd.f32 3.0, %v611_v47 }
 0x26f   :  { %v653_v58 = vadd.f32 1.0, %v611_v47  ;;  %v1694_v20 = vmin.f32 %v582_v9, 1.0  ;;  %v585_v21 = vmin.f32 %v583_v10, 1.0  ;;  %v652_v41 = vadd.f32 1.0, %v610_v50 }
 0x270   :  { %v985_v59 = vadd.f32 -6.0, %v612_v54  ;;  %v986_v60 = vadd.f32 -6.0, %v613_v55  ;;  %v988_v62 = vadd.f32 -6.0, %v633_v57  ;;  %v987_v11 = vadd.f32 -6.0, %v632_v56 }
 0x271   :  { %vm615_vm15 = vcmp.ge.f32.partialorder %v613_v55, 6.0  ;;  %vm635_vm1 = vcmp.ge.f32.partialorder %v633_v57, 6.0  ;;  %vm614_vm2 = vcmp.ge.f32.partialorder %v612_v54, 6.0  ;;  %v990_v13 = vadd.f32 -6.0, %v653_v58 }
 0x272   :  { %v619_v43 = vsel %vm615_vm15, %v986_v60, %v613_v55  ;;  %v639_v15 = vsel %vm635_vm1, %v988_v62, %v633_v57  ;;  %v618_v45 = vsel %vm614_vm2, %v985_v59, %v612_v54  ;;  %vm634_vm3 = vcmp.ge.f32.partialorder %v632_v56, 6.0 }
 0x273   :  { %v621_v17 = vsub.f32 4.0, %v619_v43  ;;  %v641_v18 = vsub.f32 4.0, %v639_v15  ;;  %v620_v19 = vsub.f32 4.0, %v618_v45  ;;  %vm655_vm4 = vcmp.ge.f32.partialorder %v653_v58, 6.0 }
 0x274   :  { %v638_v8 = vsel %vm634_vm3, %v987_v11, %v632_v56  ;;  %v659_v25 = vsel %vm655_vm4, %v990_v13, %v653_v58  ;;  %v607_v30 = vmul.f32 %v605_v16, %v585_v21  ;;  %v1697_v31 = vmul.f32 %v604_v61, %v1694_v20 }
 0x275   :  { %v623_v22 = vmin.f32 %v619_v43, %v621_v17  ;;  %v643_v1 = vmin.f32 %v639_v15, %v641_v18  ;;  %v622_v23 = vmin.f32 %v618_v45, %v620_v19  ;;  %v640_v24 = vsub.f32 4.0, %v638_v8 }
 0x276   :  { %v661_v29 = vsub.f32 4.0, %v659_v25  ;;  %v609_v49 = vsub.f32 %v585_v21, %v607_v30  ;;  %v1702_v47 = vsub.f32 %v1694_v20, %v1697_v31  ;;  %v989_v60 = vadd.f32 -6.0, %v652_v41 }
 0x277   :  { %v625_v26 = vmax.f32 %v623_v22, 0.0  ;;  %v645_v27 = vmax.f32 %v643_v1, 0.0  ;;  %v624_v28 = vmax.f32 %v622_v23, 0.0  ;;  %v642_v32 = vmin.f32 %v638_v8, %v640_v24 }
 0x278   :  { %v663_v34 = vmin.f32 %v659_v25, %v661_v29  ;;  %vm654_vm7 = vcmp.ge.f32.partialorder %v652_v41, 6.0  ;;  %v1322_v23 = vmov 3   ;;  %v942_v25 = vsel %vm41_vm0, 1, %v1321_v6 }
 0x279   :  { %v627_v33 = vmin.f32 %v625_v26, 1.0  ;;  %v647_v3 = vmin.f32 %v645_v27, 1.0  ;;  %v626_v5 = vmin.f32 %v624_v28, 1.0  ;;  %v644_v2 = vmax.f32 %v642_v32, 0.0 }
 0x27a   :  { %v665_v40 = vmax.f32 %v663_v34, 0.0  ;;  %v658_v9 = vsel %vm654_vm7, %v989_v60, %v652_v41  ;;  %v1323_v26 = vmov 4  }
 0x27b   :  { %v629_v4 = vmul.f32 %v627_v33, %v607_v30  ;;  %v649_v37 = vmul.f32 %v647_v3, %v607_v30  ;;  %v628_v38 = vmul.f32 %v626_v5, %v1697_v31  ;;  %v646_v48 = vmin.f32 %v644_v2, 1.0 }
 0x27c   :  { %v667_v54 = vmin.f32 %v665_v40, 1.0  ;;  %v660_v10 = vsub.f32 4.0, %v658_v9 }
 0x27d   :  { %v631_v51 = vsub.f32 %v585_v21, %v629_v4  ;;  %v651_v52 = vsub.f32 %v585_v21, %v649_v37  ;;  %v630_v53 = vsub.f32 %v1694_v20, %v628_v38  ;;  %v648_v55 = vmul.f32 %v646_v48, %v1697_v31 }
 0x27e   :  { %v669_v58 = vmul.f32 %v667_v54, %v607_v30  ;;  %v662_v46 = vmin.f32 %v658_v9, %v660_v10 }
 0x27f   :  { %v1710_v50 = vsel %vm673_vm5, %v609_v49, %v631_v51  ;;  %v1714_v56 = vsel %vm673_vm5, %v609_v49, %v651_v52  ;;  %v1719_v57 = vsel %vm672_vm6, %v1702_v47, %v630_v53  ;;  %v650_v59 = vsub.f32 %v1694_v20, %v648_v55 }
 0x280   :  { %744 = vmatprep.mubr.f32.mxu0 %v1710_v50  ;;  %815 = vmatprep.mubr.f32.mxu1 %v1714_v56  ;;  %v671_v62 = vsub.f32 %v585_v21, %v669_v58  ;;  %v664_v11 = vmax.f32 %v662_v46, 0.0 }
 0x281   :  { %745 = vmatmul.mubr.f32.vlgmr.msra.gmra.mxu0 %v1719_v57  ;;  %v1728_v63 = vsel %vm672_vm6, %v1702_v47, %v650_v59 }
 0x282   :  { %1167 = vmatpush3.msra.mxu0 %v1320_v7  ;;  %816 = vmatmul.mubr.f32.vlgmr.msra.gmra.mxu1 %v1728_v63  ;;  %v1735_v61 = vsel %vm673_vm5, %v609_v49, %v671_v62  ;;  %v666_v13 = vmin.f32 %v664_v11, 1.0 }
 0x283   :  { %1168 = vmatprep.subr.mxu0 %v1320_v7  ;;  %886 = vmatprep.mubr.f32.mxu0 %v1735_v61 }
 0x284   :  { %1169 = vmatpush3.msra.mxu0 %v1320_v7  ;;  %v668_v43 = vmul.f32 %v666_v13, %v1697_v31 }
 0x285   :  { %1170 = vmatprep.subr.mxu0 %v1320_v7 }
 0x286   :  { %1171 = vmatpush3.msra.mxu0 %v1320_v7  ;;  %v670_v15 = vsub.f32 %v1694_v20, %v668_v43 }
 0x287   :  { %1172 = vmatprep.subr.mxu0 %v1320_v7 }
 0x288   :  { %1173 = vmatpush3.msra.mxu0 %v1320_v7  ;;  %v678_v45 = vsel %vm672_vm6, %v1702_v47, %v670_v15 }
 0x289   :  { %1174 = vmatprep.subr.mxu0 %v1320_v7 }
 0x28a   :  { %1175 = vmatpush3.msra.mxu0 %v1320_v7 }
 0x28b   :  { %1176 = vmatprep.subr.mxu0 %v1320_v7 }
 0x28c   :  { %1177 = vmatpush3.msra.mxu0 %v1320_v7 }
 0x28d   :  { %1178 = vmatprep.subr.mxu0 %v1320_v7 }
 0x28e   :  { %1179 = vmatpush3.msra.mxu0 %v1320_v7 }
 0x28f   :  { %1180 = vmatprep.subr.mxu0 %v1320_v7 }
 0x290   :  { %1181 = vmatpush3.msra.mxu0 %v1320_v7 }
 0x291   :  { %1182 = vmatprep.subr.mxu0 %v1320_v7 }
 0x292   :  { %1183 = vmatpush3.msra.mxu0 %v1320_v7 }
 0x293   :  { %1184 = vmatprep.subr.mxu0 %v1320_v7 }
 0x294   :  { %1185 = vmatpush3.msra.mxu0 %v1320_v7 }
 0x295   :  { %1186 = vmatprep.subr.mxu0 %v1320_v7 }
 0x296   :  { %1187 = vmatpush3.msra.mxu0 %v1320_v7 }
 0x297   :  { %1188 = vmatprep.subr.mxu0 %v1320_v7 }
 0x298   :  { %1189 = vmatpush3.msra.mxu0 %v1320_v7 }
 0x299   :  { %1190 = vmatprep.subr.mxu0 %v1320_v7 }
 0x29a   :  { %1191 = vmatpush3.msra.mxu0 %v1320_v7 }
 0x29b   :  { %1192 = vmatprep.subr.mxu0 %v1320_v7 }
 0x29c   :  { %1193 = vmatpush3.msra.mxu0 %v1320_v7 }
 0x29d   :  { %1194 = vmatprep.subr.mxu0 %v1320_v7 }
 0x29e   :  { %1195 = vmatpush3.msra.mxu0 %v1320_v7 }
 0x29f   :  { %1196 = vmatprep.subr.mxu0 %v1320_v7 }
 0x2a0   :  { %1197 = vmatpush3.msra.mxu0 %v1320_v7 }
 0x2a1   :  { %887 = vmatmul.mubr.f32.vlgmr.msra.gmra.mxu0 %v678_v45 }
 0x341   :  { %v1128_v16 = vpop.f32.mrf.mxu0 }
 0x342   :  { %v1163_v17 = vpop.f32.mrf.mxu1 }
 0x343   :  { %v1129_v18 = vpop.f32.mrf.mxu0 }
 0x344   :  { %v1130_v19 = vadd.f32 %v1129_v18, %v1128_v16  ;;  %v1164_v21 = vpop.f32.mrf.mxu1 }
 0x345   :  { %v1165_v20 = vadd.f32 %v1164_v21, %v1163_v17 }
 0x346   :  { %v750_v22 = vmul.f32 0.00390625, %v1130_v19 }
 0x347   :  { %v821_v1 = vmul.f32 0.00390625, %v1165_v20 }
 0x348   :  { %895 = vperm.xlu1 %1233, %v750_v22  }
 0x34c   :  { %914 = vperm.xlu1 %1233, %v821_v1  }
 0x350   :  { %1234 = vset.pattern.permute.xlu1 %v1322_v23 }
 0x351   :  { %901 = vperm.xlu1 %1234, %v1354_v0  }
 0x361   :  { %v1198_v7 = vpop.f32.mrf.mxu0 }
 0x363   :  { %v1199_v8 = vpop.f32.mrf.mxu0 }
 0x364   :  { %v1200_v24 = vadd.f32 %v1199_v8, %v1198_v7 }
 0x366   :  { %v892_v44 = vmul.f32 0.00390625, %v1200_v24 }
 0x368   :  { %929 = vperm.xlu0 %1231, %v892_v44  }
 0x36c   :  { %1235 = vset.pattern.permute.xlu0 %v1323_v26 }
 0x36d   :  { %944 = vperm.xlu0 %1235, %v942_v25  }
 0x3c3   :  { %v896_v27 = vpop.permute.xlu1 %895 }
 0x3c4   :  { %v898_v30 = vsub.f32 %v1719_v57, %v896_v27  ;;  %v899_v31 = vsub.f32 %v1710_v50, %v896_v27 }
 0x3c7   :  { %v915_v28 = vpop.permute.xlu1 %914 }
 0x3c8   :  { %v917_v32 = vsub.f32 %v1728_v63, %v915_v28  ;;  %v918_v33 = vsub.f32 %v1714_v56, %v915_v28 }
 0x3cc   :  { %v902_v29 = vpop.permute.xlu1 %901 }
 0x3cd   :  { %v904_v3 = vmul.f32 %v902_v29, %v898_v30  ;;  %v905_v5 = vmul.f32 %v902_v29, %v899_v31  ;;  %v919_v34 = vmul.f32 %v917_v32, %v902_v29  ;;  %v920_v2 = vmul.f32 %v918_v33, %v902_v29 }
 0x3cf   :  { %v906_v0 = vadd.f32 %v904_v3, %v896_v27  ;;  %v907_v6 = vadd.f32 %v905_v5, %v896_v27  ;;  %v921_v4 = vadd.f32 %v919_v34, %v915_v28  ;;  %v922_v37 = vadd.f32 %v920_v2, %v915_v28 }
 0x3d1   :  { %v908_v40 = vmax.f32 %v906_v0, 0.0  ;;  %v909_v41 = vmax.f32 %v907_v6, 0.0  ;;  %v923_v48 = vmax.f32 %v921_v4, 0.0  ;;  %v924_v51 = vmax.f32 %v922_v37, 0.0 }
 0x3d3   :  { %v910_v54 = vmin.f32 %v908_v40, 1.0  ;;  %v911_v55 = vmin.f32 %v909_v41, 1.0  ;;  %v925_v58 = vmin.f32 %v923_v48, 1.0  ;;  %v926_v59 = vmin.f32 %v924_v51, 1.0 }
 0x3e3   :  { %v930_v38 = vpop.permute.xlu0 %929 }
 0x3e4   :  { %v932_v49 = vsub.f32 %v678_v45, %v930_v38  ;;  %v933_v47 = vsub.f32 %v1735_v61, %v930_v38 }
 0x3e6   :  { %v934_v52 = vmul.f32 %v932_v49, %v902_v29  ;;  %v935_v53 = vmul.f32 %v933_v47, %v902_v29 }
 0x3e8   :  { %v936_v50 = vadd.f32 %v934_v52, %v930_v38  ;;  %v937_v56 = vadd.f32 %v935_v53, %v930_v38  ;;  %v945_v57 = vpop.permute.xlu0 %944 }
 0x3e9   :  { %vm946_vm0 = vcmp.eq.s32.totalorder %v945_v57, 1 }
 0x3ea   :  { %v938_v60 = vmax.f32 %v936_v50, 0.0  ;;  %v939_v62 = vmax.f32 %v937_v56, 0.0  ;;  %v947_v63 = vsel %vm946_vm0, %v910_v54, %v1624_v12  ;;  %v948_v9 = vsel %vm946_vm0, %v911_v55, %v1628_v35 }
 0x3eb   :  { %949 = vst [vmem:[#allocation8] sm:$0xff] %v947_v63  ;;  %950 = vst [vmem:[#allocation8 + $0x8] sm:$0xff] %v948_v9  ;;  %v953_v61 = vsel %vm946_vm0, %v925_v58, %v1626_v14  ;;  %v954_v10 = vsel %vm946_vm0, %v926_v59, %v1630_v36 }
 0x3ec   :  { %v940_v46 = vmin.f32 %v938_v60, 1.0  ;;  %v941_v11 = vmin.f32 %v939_v62, 1.0  ;;  %955 = vst [vmem:[#allocation8 + $0x10] sm:$0xff] %v953_v61  ;;  %956 = vst [vmem:[#allocation8 + $0x18] sm:$0xff] %v954_v10 }
 0x3ee   :  { %v959_v13 = vsel %vm946_vm0, %v940_v46, %v1636_v39  ;;  %v960_v43 = vsel %vm946_vm0, %v941_v11, %v1642_v42 }
 0x3ef   :  { %961 = vst [vmem:[#allocation8 + $0x20] sm:$0xff] %v959_v13  ;;  %962 = vst [vmem:[#allocation8 + $0x28] sm:$0xff] %v960_v43 }
 0x3f0 PF:  { %s1324_s0 = smov [#allocation8]  }
 0x3f1   :  { %s969_s24 = sshll.u32 %s1324_s0, 4  ;;  %s970_s24 = int_to_ptr.vmem [resolvable:$true] %s969_s24 }
 0x3f2   :  { %s1284_s25 = scalar_lea.vmem %s970_s24, 768  ;;  %p1289_p13 = scmp.lt.s32.totalorder %s970_s24, %s970_s24 }
 0x3f3   :  { %p1285_p12 = scmp.ne.s32.totalorder %s970_s24, %s1284_s25  ;;  %p1290_p0 = scmp.lt.s32.totalorder %s1284_s25, %s1284_s25 }
 0x3f5   :  { %p1291_p1 = por %p1290_p0, %p1289_p13 }
 0x3f7   :  { %p1292_p2 = pnand %p1291_p1, %p1285_p12 }
 0x3f9   :  { %1295 = shalt.err (!%p1292_p2)
}
 0x3fa   :  { %972 = dma.vmem_to_hbm [thread:$0]  %s970_s24, 768, %s1793_s3, [#allocation5]  }
 0x3fb   :  { %1308 = dma.done.wait [#allocation5], 768  }
 0x3fc   :  { %1309 = vsyncadd [#allocation5], 4294966528 }
 0x3fd   :  { %976 = vsyncpa [#allocation4], 1 }
 0x3fe   :  { %977 = vsyncpa [#allocation7], 1 }
 0x3ff   :  { %978 = vsyncpa [#allocation5], 1 }

</bundles_post_ra>
